<compile_context>
chip_gen: v7x
topology: tpu7x:2x2x1
jax: 0.10.0
libtpu: 0.0.40
codegen_flags: <defaults>
</compile_context>

<pallas_src>
import functools

import jax
import jax.numpy as jnp
from jax.experimental import pallas as pl
from jax.experimental.pallas import tpu as pltpu


def asf_kernel(x_ref, w1s_ref, b1_ref, scal_ref, mask_ref, w2s_ref, b2_ref,
               out_ref, *, N, C, H, W, Bt):
    NC = N * C
    HW = H * W
    Np = w2s_ref.shape[0] // 9            # conv_part2 out-channels padded to sublane multiple
    offsets = [(dy, dx) for dy in (-1, 0, 1) for dx in (-1, 0, 1)]

    # Hoisted loads: constant across the batch_block loop (and across grid steps the
    # constant index_maps keep these resident, no re-DMA).
    w1s = w1s_ref[...]                    # (9*C, NC)  bf16, tap-stacked conv1 weights
    w2s = w2s_ref[...]                    # (9*Np, C)  bf16, tap-stacked conv_part2 weights
    b1 = b1_ref[...]                      # (C, 1)     f32
    b2 = b2_ref[...]                      # (Np, 1)    f32
    mask = mask_ref[...]                  # (8, HW)    f32 boundary masks, non-centre taps
    sc = [scal_ref[i] for i in range(12)]  # SA scalar params from SMEM

    def accum_taps(y, rows):
        """3x3 conv from per-tap matmul results: sum_t mask_t * roll(y_tap_t)."""
        acc = None
        mi = 0
        for t, (dy, dx) in enumerate(offsets):
            blk = y[t * rows:(t + 1) * rows, :]            # 8-aligned sublane slice
            off = dy * W + dx
            if off == 0:
                contrib = blk                              # centre tap: no shift/mask
            else:
                contrib = mask[mi:mi + 1, :] * pltpu.roll(
                    blk, shift=(-off) % HW, axis=1)
                mi += 1
            acc = contrib if acc is None else acc + contrib
        return acc

    for bb in range(Bt):                  # static loop: Bt images per grid step
        x = x_ref[bb]                                                   # (NC, HW) f32

        # ---- conv1 (3x3, NC -> C): one (9*C, NC) @ (NC, HW) matmul, then taps ----
        y1 = jnp.dot(w1s, x.astype(jnp.bfloat16),
                     preferred_element_type=jnp.float32)                # (9*C, HW)
        xp1 = accum_taps(y1, C) + b1                                    # (C, HW)

        # ---- SA.conv_part1: mean(C) -> 1x1 conv + ReLU -> 3x3 conv -> Sigmoid ----
        m = jnp.mean(xp1, axis=0, keepdims=True)                        # (1, HW)
        a = jnp.maximum(m * sc[0] + sc[1], 0.0)
        att = jnp.zeros((1, HW), jnp.float32)
        mi = 0
        for t, (dy, dx) in enumerate(offsets):
            off = dy * W + dx
            if off == 0:
                tap = a
            else:
                tap = mask[mi:mi + 1, :] * pltpu.roll(a, shift=(-off) % HW, axis=1)
                mi += 1
            att = att + tap * sc[3 + t]
        att = jax.nn.sigmoid(att + sc[2])                               # (1, HW)

        # ---- SA.conv_part2 (3x3, C -> N) + Sigmoid (rows padded to Np, not NC) ----
        s = xp1 + att                                                   # (C, HW)
        y2 = jnp.dot(w2s, s.astype(jnp.bfloat16),
                     preferred_element_type=jnp.float32)                # (9*Np, HW)
        wts = jax.nn.sigmoid(accum_taps(y2, Np) + b2)                   # (Np, HW)

        # ---- adaptive fusion: broadcast each of the N weight rows over C channels ----
        for n in range(N):
            out_ref[bb, n * C:(n + 1) * C, :] = (
                x[n * C:(n + 1) * C, :] * wts[n:n + 1, :]).astype(out_ref.dtype)


def adaptive_scale_fusion(x_nchw, w1_hwio, b1, scal, w2_hwio, b2, *, N, C,
                          batch_block=None):
    """x_nchw: [B, N*C, H, W] float32 -> [B, N*C, H, W] (matches the PyTorch module)."""
    B, NC, H, W = x_nchw.shape
    assert NC == N * C
    HW = H * W
    assert HW % 128 == 0 and C % 8 == 0, "toy/aligned shapes only"

    if batch_block is None:
        batch_block = max(d for d in (8, 4, 2, 1) if B % d == 0)
    Bt = batch_block
    assert B % Bt == 0

    x_cm = x_nchw.reshape(B, NC, HW)                                    # free reshape

    # Stack the 9 taps' weight matrices vertically (tap-major, (ky, kx) row-major to
    # match the kernel's offsets order). bf16 operands, f32 MXU accumulation.
    w1s = jnp.transpose(w1_hwio, (0, 1, 3, 2)).reshape(9 * C, NC).astype(jnp.bfloat16)
    b1_cm = b1.reshape(C, 1).astype(jnp.float32)

    Np = -(-N // 8) * 8                       # pad conv_part2 out-channels to a sublane multiple
    w2t = jnp.transpose(w2_hwio, (0, 1, 3, 2))                          # (3, 3, N, C)
    w2t = jnp.pad(w2t, ((0, 0), (0, 0), (0, Np - N), (0, 0)))
    w2s = w2t.reshape(9 * Np, C).astype(jnp.bfloat16)
    b2_cm = jnp.pad(b2, (0, Np - N)).reshape(Np, 1).astype(jnp.float32)

    # Precompute the 8 non-centre boundary masks once (one tiny DMA, constant index_map).
    hw = jnp.arange(HW, dtype=jnp.int32)
    row, col = hw // W, hw % W
    mrows = []
    for dy in (-1, 0, 1):
        for dx in (-1, 0, 1):
            if dy == 0 and dx == 0:
                continue
            mrows.append(((row + dy >= 0) & (row + dy < H) &
                          (col + dx >= 0) & (col + dx < W)).astype(jnp.float32))
    mask = jnp.stack(mrows, axis=0)                                      # (8, HW)

    kernel = functools.partial(asf_kernel, N=N, C=C, H=H, W=W, Bt=Bt)
    grid_spec = pltpu.PrefetchScalarGridSpec(
        num_scalar_prefetch=0,
        grid=(B // Bt,),
        in_specs=[
            pl.BlockSpec((Bt, NC, HW), lambda b: (b, 0, 0)),             # x (Bt images per step)
            # constant index maps: weights/masks stay resident across grid steps
            pl.BlockSpec((9 * C, NC), lambda b: (0, 0)),                 # conv1 weights (stacked, bf16)
            pl.BlockSpec((C, 1), lambda b: (0, 0)),                      # conv1 bias
            pl.BlockSpec(memory_space=pltpu.MemorySpace.SMEM),           # SA scalar params (12,)
            pl.BlockSpec((8, HW), lambda b: (0, 0)),                     # boundary masks
            pl.BlockSpec((9 * Np, C), lambda b: (0, 0)),                 # conv_part2 weights (stacked, bf16)
            pl.BlockSpec((Np, 1), lambda b: (0, 0)),                     # conv_part2 bias (padded)
        ],
        out_specs=pl.BlockSpec((Bt, NC, HW), lambda b: (b, 0, 0)),
    )
    out = pl.pallas_call(
        kernel,
        out_shape=jax.ShapeDtypeStruct((B, NC, HW), x_nchw.dtype),
        grid_spec=grid_spec,
        compiler_params=pltpu.CompilerParams(
            dimension_semantics=("parallel",)),                          # shards batch blocks on v7x's 2 TCs
    )(x_cm, w1s, b1_cm, scal, mask, w2s, b2_cm)
    return out.reshape(B, NC, H, W)


# ---------------- pure-JAX NCHW reference (mirrors the PyTorch module) ----------------
def _conv_nchw(x, w_hwio, b, pad):
    y = jax.lax.conv_general_dilated(
        x, w_hwio, window_strides=(1, 1),
        padding=[(pad, pad), (pad, pad)],
        dimension_numbers=("NCHW", "HWIO", "NCHW"),
        precision=jax.lax.Precision.HIGHEST)
    return y + b.reshape(1, -1, 1, 1)


def reference_nchw(x, w1, b1, scal, w2, b2, *, N, C):
    B, NC, H, W = x.shape
    xp1 = _conv_nchw(x, w1, b1, pad=1)                                   # [B, C, H, W]
    m = jnp.mean(xp1, axis=1, keepdims=True)                             # [B, 1, H, W]
    a = jax.nn.relu(m * scal[0] + scal[1])                               # 1x1 conv + ReLU
    k3 = scal[3:12].reshape(3, 3, 1, 1)
    att = jax.nn.sigmoid(_conv_nchw(a, k3, scal[2:3], pad=1))            # [B, 1, H, W]
    s = att + xp1
    wts = jax.nn.sigmoid(_conv_nchw(s, w2, b2, pad=1))                   # [B, N, H, W]
    out = x.reshape(B, N, C, H, W) * wts[:, :, None]
    return out.reshape(B, N * C, H, W)


if __name__ == "__main__":
    B, N, C, H, W = 2, 4, 8, 16, 16
    NC = N * C

    key = jax.random.PRNGKey(0)
    kx, k0, k1, k2, k3, k4, k5, k6, k7 = jax.random.split(key, 9)

    # deterministic synthetic parameters (conv weights stored HWIO)
    x_nchw = jax.random.normal(kx, (B, NC, H, W), jnp.float32)
    w1 = jax.random.normal(k0, (3, 3, NC, C), jnp.float32) * 0.05        # conv1
    b1 = jax.random.normal(k1, (C,), jnp.float32) * 0.05
    w2 = jax.random.normal(k2, (3, 3, C, N), jnp.float32) * 0.05         # SA.conv_part2
    b2 = jax.random.normal(k3, (N,), jnp.float32) * 0.05
    sa_1x1_w = jax.random.normal(k4, (), jnp.float32) * 0.5              # SA.conv_part1[0]
    sa_1x1_b = jax.random.normal(k5, (), jnp.float32) * 0.1
    sa_3x3_k = jax.random.normal(k6, (3, 3), jnp.float32) * 0.3          # SA.conv_part1[2]
    sa_3x3_b = jax.random.normal(k7, (), jnp.float32) * 0.1
    scal = jnp.concatenate(
        [jnp.stack([sa_1x1_w, sa_1x1_b, sa_3x3_b]), sa_3x3_k.reshape(-1)]
    ).astype(jnp.float32)                                                # (12,) scalar params

    # run the Pallas kernel (NCHW in, NCHW out -- no layout shuffles needed)
    out = adaptive_scale_fusion(x_nchw, w1, b1, scal, w2, b2, N=N, C=C)
    jax.block_until_ready(out)

    # verify against the pure-JAX reference of the PyTorch module
    # (kernel matmuls use bf16 operands with f32 MXU accumulation vs the HIGHEST
    #  precision f32 reference, so allow ~1e-2 slack; elementwise math stays f32)
    ref = reference_nchw(x_nchw, w1, b1, scal, w2, b2, N=N, C=C)
    assert out.shape == (B, NC, H, W)
    assert jnp.allclose(out, ref, atol=1e-2, rtol=1e-2), float(
        jnp.max(jnp.abs(out - ref)))

    print("KERNEL_OK")
</pallas_src>

<mosaic_0001>
module attributes {stable_mosaic.version = 11 : i64} {
  func.func @asf_kernel(%arg0: i32, %arg1: memref<2x32x256xf32, #tpu.memory_space<vmem>>, %arg2: memref<72x32xbf16, #tpu.memory_space<vmem>>, %arg3: memref<8x1xf32, #tpu.memory_space<vmem>>, %arg4: memref<12xf32, #tpu.memory_space<smem>>, %arg5: memref<8x256xf32, #tpu.memory_space<vmem>>, %arg6: memref<72x8xbf16, #tpu.memory_space<vmem>>, %arg7: memref<8x1xf32, #tpu.memory_space<vmem>>, %arg8: memref<2x32x256xf32, #tpu.memory_space<vmem>>) attributes {dimension_semantics = [#tpu.dimension_semantics<parallel>], iteration_bounds = array<i64: 1>, scalar_prefetch = 0 : i64, scratch_operands = 0 : i64, tpu.core_type = #tpu.core_type<tc>, window_params = [{transform_indices = @transform_0, window_bounds = array<i64: 2, 32, 256>}, {pipeline_mode = #tpu.pipeline_mode<synchronous>, transform_indices = @transform_1, window_bounds = array<i64: 72, 32>}, {pipeline_mode = #tpu.pipeline_mode<synchronous>, transform_indices = @transform_2, window_bounds = array<i64: 8, 1>}, {transform_indices = @transform_3, window_bounds = array<i64: 12>}, {pipeline_mode = #tpu.pipeline_mode<synchronous>, transform_indices = @transform_4, window_bounds = array<i64: 8, 256>}, {pipeline_mode = #tpu.pipeline_mode<synchronous>, transform_indices = @transform_5, window_bounds = array<i64: 72, 8>}, {pipeline_mode = #tpu.pipeline_mode<synchronous>, transform_indices = @transform_6, window_bounds = array<i64: 8, 1>}, {transform_indices = @transform_7, window_bounds = array<i64: 2, 32, 256>}]} {
    %c0 = arith.constant 0 : index
    %c0_0 = arith.constant 0 : index
    %0 = vector.load %arg2[%c0, %c0_0] : memref<72x32xbf16, #tpu.memory_space<vmem>>, vector<72x32xbf16>
    %c0_1 = arith.constant 0 : index
    %c0_2 = arith.constant 0 : index
    %1 = vector.load %arg6[%c0_1, %c0_2] : memref<72x8xbf16, #tpu.memory_space<vmem>>, vector<72x8xbf16>
    %c0_3 = arith.constant 0 : index
    %c0_4 = arith.constant 0 : index
    %2 = vector.load %arg3[%c0_3, %c0_4] : memref<8x1xf32, #tpu.memory_space<vmem>>, vector<8x1xf32>
    %c0_5 = arith.constant 0 : index
    %c0_6 = arith.constant 0 : index
    %3 = vector.load %arg7[%c0_5, %c0_6] : memref<8x1xf32, #tpu.memory_space<vmem>>, vector<8x1xf32>
    %c0_7 = arith.constant 0 : index
    %c0_8 = arith.constant 0 : index
    %4 = vector.load %arg5[%c0_7, %c0_8] : memref<8x256xf32, #tpu.memory_space<vmem>>, vector<8x256xf32>
    %c0_9 = arith.constant 0 : index
    %5 = memref.load %arg4[%c0_9] : memref<12xf32, #tpu.memory_space<smem>>
    %c1 = arith.constant 1 : index
    %6 = memref.load %arg4[%c1] : memref<12xf32, #tpu.memory_space<smem>>
    %c2 = arith.constant 2 : index
    %7 = memref.load %arg4[%c2] : memref<12xf32, #tpu.memory_space<smem>>
    %c3 = arith.constant 3 : index
    %8 = memref.load %arg4[%c3] : memref<12xf32, #tpu.memory_space<smem>>
    %c4 = arith.constant 4 : index
    %9 = memref.load %arg4[%c4] : memref<12xf32, #tpu.memory_space<smem>>
    %c5 = arith.constant 5 : index
    %10 = memref.load %arg4[%c5] : memref<12xf32, #tpu.memory_space<smem>>
    %c6 = arith.constant 6 : index
    %11 = memref.load %arg4[%c6] : memref<12xf32, #tpu.memory_space<smem>>
    %c7 = arith.constant 7 : index
    %12 = memref.load %arg4[%c7] : memref<12xf32, #tpu.memory_space<smem>>
    %c8 = arith.constant 8 : index
    %13 = memref.load %arg4[%c8] : memref<12xf32, #tpu.memory_space<smem>>
    %c9 = arith.constant 9 : index
    %14 = memref.load %arg4[%c9] : memref<12xf32, #tpu.memory_space<smem>>
    %c10 = arith.constant 10 : index
    %15 = memref.load %arg4[%c10] : memref<12xf32, #tpu.memory_space<smem>>
    %c11 = arith.constant 11 : index
    %16 = memref.load %arg4[%c11] : memref<12xf32, #tpu.memory_space<smem>>
    %c0_10 = arith.constant 0 : index
    %c0_11 = arith.constant 0 : index
    %c0_12 = arith.constant 0 : index
    %17 = vector.load %arg1[%c0_10, %c0_11, %c0_12] : memref<2x32x256xf32, #tpu.memory_space<vmem>>, vector<1x32x256xf32>
    %18 = vector.shape_cast %17 : vector<1x32x256xf32> to vector<32x256xf32>
    %19 = arith.truncf %18 : vector<32x256xf32> to vector<32x256xbf16>
    %cst = arith.constant dense<0.000000e+00> : vector<72x256xf32>
    %20 = tpu.matmul %0, %19, %cst {dimension_numbers = #tpu.dot_dimension_numbers<[1], [0], [0], [1], [0, 0, 1, 1], [], []>} : vector<72x32xbf16>, vector<32x256xbf16>, vector<72x256xf32> -> vector<72x256xf32>
    %21 = vector.extract_strided_slice %20 {offsets = [0, 0], sizes = [8, 256], strides = [1, 1]} : vector<72x256xf32> to vector<8x256xf32>
    %22 = vector.extract_strided_slice %4 {offsets = [0, 0], sizes = [1, 256], strides = [1, 1]} : vector<8x256xf32> to vector<1x256xf32>
    %c17_i32 = arith.constant 17 : i32
    %23 = tpu.dynamic_rotate %21 by %c17_i32 dim 1 : vector<8x256xf32>, i32 -> vector<8x256xf32>
    %24 = vector.broadcast %22 : vector<1x256xf32> to vector<8x256xf32>
    %25 = arith.mulf %24, %23 : vector<8x256xf32>
    %26 = vector.extract_strided_slice %20 {offsets = [8, 0], sizes = [8, 256], strides = [1, 1]} : vector<72x256xf32> to vector<8x256xf32>
    %27 = vector.extract_strided_slice %4 {offsets = [1, 0], sizes = [1, 256], strides = [1, 1]} : vector<8x256xf32> to vector<1x256xf32>
    %c16_i32 = arith.constant 16 : i32
    %28 = tpu.dynamic_rotate %26 by %c16_i32 dim 1 : vector<8x256xf32>, i32 -> vector<8x256xf32>
    %29 = vector.broadcast %27 : vector<1x256xf32> to vector<8x256xf32>
    %30 = arith.mulf %29, %28 : vector<8x256xf32>
    %31 = arith.addf %25, %30 : vector<8x256xf32>
    %32 = vector.extract_strided_slice %20 {offsets = [16, 0], sizes = [8, 256], strides = [1, 1]} : vector<72x256xf32> to vector<8x256xf32>
    %33 = vector.extract_strided_slice %4 {offsets = [2, 0], sizes = [1, 256], strides = [1, 1]} : vector<8x256xf32> to vector<1x256xf32>
    %c15_i32 = arith.constant 15 : i32
    %34 = tpu.dynamic_rotate %32 by %c15_i32 dim 1 : vector<8x256xf32>, i32 -> vector<8x256xf32>
    %35 = vector.broadcast %33 : vector<1x256xf32> to vector<8x256xf32>
    %36 = arith.mulf %35, %34 : vector<8x256xf32>
    %37 = arith.addf %31, %36 : vector<8x256xf32>
    %38 = vector.extract_strided_slice %20 {offsets = [24, 0], sizes = [8, 256], strides = [1, 1]} : vector<72x256xf32> to vector<8x256xf32>
    %39 = vector.extract_strided_slice %4 {offsets = [3, 0], sizes = [1, 256], strides = [1, 1]} : vector<8x256xf32> to vector<1x256xf32>
    %c1_i32 = arith.constant 1 : i32
    %40 = tpu.dynamic_rotate %38 by %c1_i32 dim 1 : vector<8x256xf32>, i32 -> vector<8x256xf32>
    %41 = vector.broadcast %39 : vector<1x256xf32> to vector<8x256xf32>
    %42 = arith.mulf %41, %40 : vector<8x256xf32>
    %43 = arith.addf %37, %42 : vector<8x256xf32>
    %44 = vector.extract_strided_slice %20 {offsets = [32, 0], sizes = [8, 256], strides = [1, 1]} : vector<72x256xf32> to vector<8x256xf32>
    %45 = arith.addf %43, %44 : vector<8x256xf32>
    %46 = vector.extract_strided_slice %20 {offsets = [40, 0], sizes = [8, 256], strides = [1, 1]} : vector<72x256xf32> to vector<8x256xf32>
    %47 = vector.extract_strided_slice %4 {offsets = [4, 0], sizes = [1, 256], strides = [1, 1]} : vector<8x256xf32> to vector<1x256xf32>
    %c255_i32 = arith.constant 255 : i32
    %48 = tpu.dynamic_rotate %46 by %c255_i32 dim 1 : vector<8x256xf32>, i32 -> vector<8x256xf32>
    %49 = vector.broadcast %47 : vector<1x256xf32> to vector<8x256xf32>
    %50 = arith.mulf %49, %48 : vector<8x256xf32>
    %51 = arith.addf %45, %50 : vector<8x256xf32>
    %52 = vector.extract_strided_slice %20 {offsets = [48, 0], sizes = [8, 256], strides = [1, 1]} : vector<72x256xf32> to vector<8x256xf32>
    %53 = vector.extract_strided_slice %4 {offsets = [5, 0], sizes = [1, 256], strides = [1, 1]} : vector<8x256xf32> to vector<1x256xf32>
    %c241_i32 = arith.constant 241 : i32
    %54 = tpu.dynamic_rotate %52 by %c241_i32 dim 1 : vector<8x256xf32>, i32 -> vector<8x256xf32>
    %55 = vector.broadcast %53 : vector<1x256xf32> to vector<8x256xf32>
    %56 = arith.mulf %55, %54 : vector<8x256xf32>
    %57 = arith.addf %51, %56 : vector<8x256xf32>
    %58 = vector.extract_strided_slice %20 {offsets = [56, 0], sizes = [8, 256], strides = [1, 1]} : vector<72x256xf32> to vector<8x256xf32>
    %59 = vector.extract_strided_slice %4 {offsets = [6, 0], sizes = [1, 256], strides = [1, 1]} : vector<8x256xf32> to vector<1x256xf32>
    %c240_i32 = arith.constant 240 : i32
    %60 = tpu.dynamic_rotate %58 by %c240_i32 dim 1 : vector<8x256xf32>, i32 -> vector<8x256xf32>
    %61 = vector.broadcast %59 : vector<1x256xf32> to vector<8x256xf32>
    %62 = arith.mulf %61, %60 : vector<8x256xf32>
    %63 = arith.addf %57, %62 : vector<8x256xf32>
    %64 = vector.extract_strided_slice %20 {offsets = [64, 0], sizes = [8, 256], strides = [1, 1]} : vector<72x256xf32> to vector<8x256xf32>
    %65 = vector.extract_strided_slice %4 {offsets = [7, 0], sizes = [1, 256], strides = [1, 1]} : vector<8x256xf32> to vector<1x256xf32>
    %c239_i32 = arith.constant 239 : i32
    %66 = tpu.dynamic_rotate %64 by %c239_i32 dim 1 : vector<8x256xf32>, i32 -> vector<8x256xf32>
    %67 = vector.broadcast %65 : vector<1x256xf32> to vector<8x256xf32>
    %68 = arith.mulf %67, %66 : vector<8x256xf32>
    %69 = arith.addf %63, %68 : vector<8x256xf32>
    %70 = vector.broadcast %2 : vector<8x1xf32> to vector<8x256xf32>
    %71 = arith.addf %69, %70 : vector<8x256xf32>
    %cst_13 = arith.constant dense<0.000000e+00> : vector<256xf32>
    %72 = vector.multi_reduction <add>, %71, %cst_13 [0] : vector<8x256xf32> to vector<256xf32>
    %73 = vector.shape_cast %72 : vector<256xf32> to vector<1x256xf32>
    %cst_14 = arith.constant 8.000000e+00 : f32
    %74 = vector.broadcast %cst_14 : f32 to vector<1x256xf32>
    %75 = arith.divf %73, %74 : vector<1x256xf32>
    %76 = vector.broadcast %5 : f32 to vector<1x256xf32>
    %77 = arith.mulf %75, %76 : vector<1x256xf32>
    %78 = vector.broadcast %6 : f32 to vector<1x256xf32>
    %79 = arith.addf %77, %78 : vector<1x256xf32>
    %cst_15 = arith.constant 0.000000e+00 : f32
    %80 = vector.broadcast %cst_15 : f32 to vector<1x256xf32>
    %81 = arith.maximumf %79, %80 : vector<1x256xf32>
    %cst_16 = arith.constant 0.000000e+00 : f32
    %82 = vector.broadcast %cst_16 : f32 to vector<1x256xf32>
    %83 = vector.extract_strided_slice %4 {offsets = [0, 0], sizes = [1, 256], strides = [1, 1]} : vector<8x256xf32> to vector<1x256xf32>
    %c17_i32_17 = arith.constant 17 : i32
    %84 = tpu.dynamic_rotate %81 by %c17_i32_17 dim 1 : vector<1x256xf32>, i32 -> vector<1x256xf32>
    %85 = arith.mulf %83, %84 : vector<1x256xf32>
    %86 = vector.broadcast %8 : f32 to vector<1x256xf32>
    %87 = arith.mulf %85, %86 : vector<1x256xf32>
    %88 = arith.addf %82, %87 : vector<1x256xf32>
    %89 = vector.extract_strided_slice %4 {offsets = [1, 0], sizes = [1, 256], strides = [1, 1]} : vector<8x256xf32> to vector<1x256xf32>
    %c16_i32_18 = arith.constant 16 : i32
    %90 = tpu.dynamic_rotate %81 by %c16_i32_18 dim 1 : vector<1x256xf32>, i32 -> vector<1x256xf32>
    %91 = arith.mulf %89, %90 : vector<1x256xf32>
    %92 = vector.broadcast %9 : f32 to vector<1x256xf32>
    %93 = arith.mulf %91, %92 : vector<1x256xf32>
    %94 = arith.addf %88, %93 : vector<1x256xf32>
    %95 = vector.extract_strided_slice %4 {offsets = [2, 0], sizes = [1, 256], strides = [1, 1]} : vector<8x256xf32> to vector<1x256xf32>
    %c15_i32_19 = arith.constant 15 : i32
    %96 = tpu.dynamic_rotate %81 by %c15_i32_19 dim 1 : vector<1x256xf32>, i32 -> vector<1x256xf32>
    %97 = arith.mulf %95, %96 : vector<1x256xf32>
    %98 = vector.broadcast %10 : f32 to vector<1x256xf32>
    %99 = arith.mulf %97, %98 : vector<1x256xf32>
    %100 = arith.addf %94, %99 : vector<1x256xf32>
    %101 = vector.extract_strided_slice %4 {offsets = [3, 0], sizes = [1, 256], strides = [1, 1]} : vector<8x256xf32> to vector<1x256xf32>
    %c1_i32_20 = arith.constant 1 : i32
    %102 = tpu.dynamic_rotate %81 by %c1_i32_20 dim 1 : vector<1x256xf32>, i32 -> vector<1x256xf32>
    %103 = arith.mulf %101, %102 : vector<1x256xf32>
    %104 = vector.broadcast %11 : f32 to vector<1x256xf32>
    %105 = arith.mulf %103, %104 : vector<1x256xf32>
    %106 = arith.addf %100, %105 : vector<1x256xf32>
    %107 = vector.broadcast %12 : f32 to vector<1x256xf32>
    %108 = arith.mulf %81, %107 : vector<1x256xf32>
    %109 = arith.addf %106, %108 : vector<1x256xf32>
    %110 = vector.extract_strided_slice %4 {offsets = [4, 0], sizes = [1, 256], strides = [1, 1]} : vector<8x256xf32> to vector<1x256xf32>
    %c255_i32_21 = arith.constant 255 : i32
    %111 = tpu.dynamic_rotate %81 by %c255_i32_21 dim 1 : vector<1x256xf32>, i32 -> vector<1x256xf32>
    %112 = arith.mulf %110, %111 : vector<1x256xf32>
    %113 = vector.broadcast %13 : f32 to vector<1x256xf32>
    %114 = arith.mulf %112, %113 : vector<1x256xf32>
    %115 = arith.addf %109, %114 : vector<1x256xf32>
    %116 = vector.extract_strided_slice %4 {offsets = [5, 0], sizes = [1, 256], strides = [1, 1]} : vector<8x256xf32> to vector<1x256xf32>
    %c241_i32_22 = arith.constant 241 : i32
    %117 = tpu.dynamic_rotate %81 by %c241_i32_22 dim 1 : vector<1x256xf32>, i32 -> vector<1x256xf32>
    %118 = arith.mulf %116, %117 : vector<1x256xf32>
    %119 = vector.broadcast %14 : f32 to vector<1x256xf32>
    %120 = arith.mulf %118, %119 : vector<1x256xf32>
    %121 = arith.addf %115, %120 : vector<1x256xf32>
    %122 = vector.extract_strided_slice %4 {offsets = [6, 0], sizes = [1, 256], strides = [1, 1]} : vector<8x256xf32> to vector<1x256xf32>
    %c240_i32_23 = arith.constant 240 : i32
    %123 = tpu.dynamic_rotate %81 by %c240_i32_23 dim 1 : vector<1x256xf32>, i32 -> vector<1x256xf32>
    %124 = arith.mulf %122, %123 : vector<1x256xf32>
    %125 = vector.broadcast %15 : f32 to vector<1x256xf32>
    %126 = arith.mulf %124, %125 : vector<1x256xf32>
    %127 = arith.addf %121, %126 : vector<1x256xf32>
    %128 = vector.extract_strided_slice %4 {offsets = [7, 0], sizes = [1, 256], strides = [1, 1]} : vector<8x256xf32> to vector<1x256xf32>
    %c239_i32_24 = arith.constant 239 : i32
    %129 = tpu.dynamic_rotate %81 by %c239_i32_24 dim 1 : vector<1x256xf32>, i32 -> vector<1x256xf32>
    %130 = arith.mulf %128, %129 : vector<1x256xf32>
    %131 = vector.broadcast %16 : f32 to vector<1x256xf32>
    %132 = arith.mulf %130, %131 : vector<1x256xf32>
    %133 = arith.addf %127, %132 : vector<1x256xf32>
    %134 = vector.broadcast %7 : f32 to vector<1x256xf32>
    %135 = arith.addf %133, %134 : vector<1x256xf32>
    %136 = arith.negf %135 : vector<1x256xf32>
    %137 = math.exp %136 : vector<1x256xf32>
    %cst_25 = arith.constant 1.000000e+00 : f32
    %138 = vector.broadcast %cst_25 : f32 to vector<1x256xf32>
    %139 = arith.addf %138, %137 : vector<1x256xf32>
    %140 = arith.divf %138, %139 : vector<1x256xf32>
    %141 = vector.broadcast %140 : vector<1x256xf32> to vector<8x256xf32>
    %142 = arith.addf %71, %141 : vector<8x256xf32>
    %143 = arith.truncf %142 : vector<8x256xf32> to vector<8x256xbf16>
    %cst_26 = arith.constant dense<0.000000e+00> : vector<72x256xf32>
    %144 = tpu.matmul %1, %143, %cst_26 {dimension_numbers = #tpu.dot_dimension_numbers<[1], [0], [0], [1], [0, 0, 1, 1], [], []>} : vector<72x8xbf16>, vector<8x256xbf16>, vector<72x256xf32> -> vector<72x256xf32>
    %145 = vector.extract_strided_slice %144 {offsets = [0, 0], sizes = [8, 256], strides = [1, 1]} : vector<72x256xf32> to vector<8x256xf32>
    %146 = vector.extract_strided_slice %4 {offsets = [0, 0], sizes = [1, 256], strides = [1, 1]} : vector<8x256xf32> to vector<1x256xf32>
    %c17_i32_27 = arith.constant 17 : i32
    %147 = tpu.dynamic_rotate %145 by %c17_i32_27 dim 1 : vector<8x256xf32>, i32 -> vector<8x256xf32>
    %148 = vector.broadcast %146 : vector<1x256xf32> to vector<8x256xf32>
    %149 = arith.mulf %148, %147 : vector<8x256xf32>
    %150 = vector.extract_strided_slice %144 {offsets = [8, 0], sizes = [8, 256], strides = [1, 1]} : vector<72x256xf32> to vector<8x256xf32>
    %151 = vector.extract_strided_slice %4 {offsets = [1, 0], sizes = [1, 256], strides = [1, 1]} : vector<8x256xf32> to vector<1x256xf32>
    %c16_i32_28 = arith.constant 16 : i32
    %152 = tpu.dynamic_rotate %150 by %c16_i32_28 dim 1 : vector<8x256xf32>, i32 -> vector<8x256xf32>
    %153 = vector.broadcast %151 : vector<1x256xf32> to vector<8x256xf32>
    %154 = arith.mulf %153, %152 : vector<8x256xf32>
    %155 = arith.addf %149, %154 : vector<8x256xf32>
    %156 = vector.extract_strided_slice %144 {offsets = [16, 0], sizes = [8, 256], strides = [1, 1]} : vector<72x256xf32> to vector<8x256xf32>
    %157 = vector.extract_strided_slice %4 {offsets = [2, 0], sizes = [1, 256], strides = [1, 1]} : vector<8x256xf32> to vector<1x256xf32>
    %c15_i32_29 = arith.constant 15 : i32
    %158 = tpu.dynamic_rotate %156 by %c15_i32_29 dim 1 : vector<8x256xf32>, i32 -> vector<8x256xf32>
    %159 = vector.broadcast %157 : vector<1x256xf32> to vector<8x256xf32>
    %160 = arith.mulf %159, %158 : vector<8x256xf32>
    %161 = arith.addf %155, %160 : vector<8x256xf32>
    %162 = vector.extract_strided_slice %144 {offsets = [24, 0], sizes = [8, 256], strides = [1, 1]} : vector<72x256xf32> to vector<8x256xf32>
    %163 = vector.extract_strided_slice %4 {offsets = [3, 0], sizes = [1, 256], strides = [1, 1]} : vector<8x256xf32> to vector<1x256xf32>
    %c1_i32_30 = arith.constant 1 : i32
    %164 = tpu.dynamic_rotate %162 by %c1_i32_30 dim 1 : vector<8x256xf32>, i32 -> vector<8x256xf32>
    %165 = vector.broadcast %163 : vector<1x256xf32> to vector<8x256xf32>
    %166 = arith.mulf %165, %164 : vector<8x256xf32>
    %167 = arith.addf %161, %166 : vector<8x256xf32>
    %168 = vector.extract_strided_slice %144 {offsets = [32, 0], sizes = [8, 256], strides = [1, 1]} : vector<72x256xf32> to vector<8x256xf32>
    %169 = arith.addf %167, %168 : vector<8x256xf32>
    %170 = vector.extract_strided_slice %144 {offsets = [40, 0], sizes = [8, 256], strides = [1, 1]} : vector<72x256xf32> to vector<8x256xf32>
    %171 = vector.extract_strided_slice %4 {offsets = [4, 0], sizes = [1, 256], strides = [1, 1]} : vector<8x256xf32> to vector<1x256xf32>
    %c255_i32_31 = arith.constant 255 : i32
    %172 = tpu.dynamic_rotate %170 by %c255_i32_31 dim 1 : vector<8x256xf32>, i32 -> vector<8x256xf32>
    %173 = vector.broadcast %171 : vector<1x256xf32> to vector<8x256xf32>
    %174 = arith.mulf %173, %172 : vector<8x256xf32>
    %175 = arith.addf %169, %174 : vector<8x256xf32>
    %176 = vector.extract_strided_slice %144 {offsets = [48, 0], sizes = [8, 256], strides = [1, 1]} : vector<72x256xf32> to vector<8x256xf32>
    %177 = vector.extract_strided_slice %4 {offsets = [5, 0], sizes = [1, 256], strides = [1, 1]} : vector<8x256xf32> to vector<1x256xf32>
    %c241_i32_32 = arith.constant 241 : i32
    %178 = tpu.dynamic_rotate %176 by %c241_i32_32 dim 1 : vector<8x256xf32>, i32 -> vector<8x256xf32>
    %179 = vector.broadcast %177 : vector<1x256xf32> to vector<8x256xf32>
    %180 = arith.mulf %179, %178 : vector<8x256xf32>
    %181 = arith.addf %175, %180 : vector<8x256xf32>
    %182 = vector.extract_strided_slice %144 {offsets = [56, 0], sizes = [8, 256], strides = [1, 1]} : vector<72x256xf32> to vector<8x256xf32>
    %183 = vector.extract_strided_slice %4 {offsets = [6, 0], sizes = [1, 256], strides = [1, 1]} : vector<8x256xf32> to vector<1x256xf32>
    %c240_i32_33 = arith.constant 240 : i32
    %184 = tpu.dynamic_rotate %182 by %c240_i32_33 dim 1 : vector<8x256xf32>, i32 -> vector<8x256xf32>
    %185 = vector.broadcast %183 : vector<1x256xf32> to vector<8x256xf32>
    %186 = arith.mulf %185, %184 : vector<8x256xf32>
    %187 = arith.addf %181, %186 : vector<8x256xf32>
    %188 = vector.extract_strided_slice %144 {offsets = [64, 0], sizes = [8, 256], strides = [1, 1]} : vector<72x256xf32> to vector<8x256xf32>
    %189 = vector.extract_strided_slice %4 {offsets = [7, 0], sizes = [1, 256], strides = [1, 1]} : vector<8x256xf32> to vector<1x256xf32>
    %c239_i32_34 = arith.constant 239 : i32
    %190 = tpu.dynamic_rotate %188 by %c239_i32_34 dim 1 : vector<8x256xf32>, i32 -> vector<8x256xf32>
    %191 = vector.broadcast %189 : vector<1x256xf32> to vector<8x256xf32>
    %192 = arith.mulf %191, %190 : vector<8x256xf32>
    %193 = arith.addf %187, %192 : vector<8x256xf32>
    %194 = vector.broadcast %3 : vector<8x1xf32> to vector<8x256xf32>
    %195 = arith.addf %193, %194 : vector<8x256xf32>
    %196 = arith.negf %195 : vector<8x256xf32>
    %197 = math.exp %196 : vector<8x256xf32>
    %cst_35 = arith.constant 1.000000e+00 : f32
    %198 = vector.broadcast %cst_35 : f32 to vector<8x256xf32>
    %199 = arith.addf %198, %197 : vector<8x256xf32>
    %200 = arith.divf %198, %199 : vector<8x256xf32>
    %201 = vector.extract_strided_slice %18 {offsets = [0, 0], sizes = [8, 256], strides = [1, 1]} : vector<32x256xf32> to vector<8x256xf32>
    %202 = vector.extract_strided_slice %200 {offsets = [0, 0], sizes = [1, 256], strides = [1, 1]} : vector<8x256xf32> to vector<1x256xf32>
    %203 = vector.broadcast %202 : vector<1x256xf32> to vector<8x256xf32>
    %204 = arith.mulf %201, %203 : vector<8x256xf32>
    %c0_36 = arith.constant 0 : index
    %c0_37 = arith.constant 0 : index
    %c0_38 = arith.constant 0 : index
    %205 = vector.load %arg8[%c0_36, %c0_37, %c0_38] : memref<2x32x256xf32, #tpu.memory_space<vmem>>, vector<1x8x256xf32>
    %206 = vector.shape_cast %205 : vector<1x8x256xf32> to vector<8x256xf32>
    %207 = vector.shape_cast %204 : vector<8x256xf32> to vector<1x8x256xf32>
    tpu.vector_store %arg8[%c0_36, %c0_37, %c0_38], %207 {strides = array<i32>} : memref<2x32x256xf32, #tpu.memory_space<vmem>>, vector<1x8x256xf32>,
    %208 = vector.extract_strided_slice %18 {offsets = [8, 0], sizes = [8, 256], strides = [1, 1]} : vector<32x256xf32> to vector<8x256xf32>
    %209 = vector.extract_strided_slice %200 {offsets = [1, 0], sizes = [1, 256], strides = [1, 1]} : vector<8x256xf32> to vector<1x256xf32>
    %210 = vector.broadcast %209 : vector<1x256xf32> to vector<8x256xf32>
    %211 = arith.mulf %208, %210 : vector<8x256xf32>
    %c0_39 = arith.constant 0 : index
    %c8_40 = arith.constant 8 : index
    %c0_41 = arith.constant 0 : index
    %212 = vector.load %arg8[%c0_39, %c8_40, %c0_41] : memref<2x32x256xf32, #tpu.memory_space<vmem>>, vector<1x8x256xf32>
    %213 = vector.shape_cast %212 : vector<1x8x256xf32> to vector<8x256xf32>
    %214 = vector.shape_cast %211 : vector<8x256xf32> to vector<1x8x256xf32>
    tpu.vector_store %arg8[%c0_39, %c8_40, %c0_41], %214 {strides = array<i32>} : memref<2x32x256xf32, #tpu.memory_space<vmem>>, vector<1x8x256xf32>,
    %215 = vector.extract_strided_slice %18 {offsets = [16, 0], sizes = [8, 256], strides = [1, 1]} : vector<32x256xf32> to vector<8x256xf32>
    %216 = vector.extract_strided_slice %200 {offsets = [2, 0], sizes = [1, 256], strides = [1, 1]} : vector<8x256xf32> to vector<1x256xf32>
    %217 = vector.broadcast %216 : vector<1x256xf32> to vector<8x256xf32>
    %218 = arith.mulf %215, %217 : vector<8x256xf32>
    %c0_42 = arith.constant 0 : index
    %c16 = arith.constant 16 : index
    %c0_43 = arith.constant 0 : index
    %219 = vector.load %arg8[%c0_42, %c16, %c0_43] : memref<2x32x256xf32, #tpu.memory_space<vmem>>, vector<1x8x256xf32>
    %220 = vector.shape_cast %219 : vector<1x8x256xf32> to vector<8x256xf32>
    %221 = vector.shape_cast %218 : vector<8x256xf32> to vector<1x8x256xf32>
    tpu.vector_store %arg8[%c0_42, %c16, %c0_43], %221 {strides = array<i32>} : memref<2x32x256xf32, #tpu.memory_space<vmem>>, vector<1x8x256xf32>,
    %222 = vector.extract_strided_slice %18 {offsets = [24, 0], sizes = [8, 256], strides = [1, 1]} : vector<32x256xf32> to vector<8x256xf32>
    %223 = vector.extract_strided_slice %200 {offsets = [3, 0], sizes = [1, 256], strides = [1, 1]} : vector<8x256xf32> to vector<1x256xf32>
    %224 = vector.broadcast %223 : vector<1x256xf32> to vector<8x256xf32>
    %225 = arith.mulf %222, %224 : vector<8x256xf32>
    %c0_44 = arith.constant 0 : index
    %c24 = arith.constant 24 : index
    %c0_45 = arith.constant 0 : index
    %226 = vector.load %arg8[%c0_44, %c24, %c0_45] : memref<2x32x256xf32, #tpu.memory_space<vmem>>, vector<1x8x256xf32>
    %227 = vector.shape_cast %226 : vector<1x8x256xf32> to vector<8x256xf32>
    %228 = vector.shape_cast %225 : vector<8x256xf32> to vector<1x8x256xf32>
    tpu.vector_store %arg8[%c0_44, %c24, %c0_45], %228 {strides = array<i32>} : memref<2x32x256xf32, #tpu.memory_space<vmem>>, vector<1x8x256xf32>,
    %c1_46 = arith.constant 1 : index
    %c0_47 = arith.constant 0 : index
    %c0_48 = arith.constant 0 : index
    %229 = vector.load %arg1[%c1_46, %c0_47, %c0_48] : memref<2x32x256xf32, #tpu.memory_space<vmem>>, vector<1x32x256xf32>
    %230 = vector.shape_cast %229 : vector<1x32x256xf32> to vector<32x256xf32>
    %231 = arith.truncf %230 : vector<32x256xf32> to vector<32x256xbf16>
    %cst_49 = arith.constant dense<0.000000e+00> : vector<72x256xf32>
    %232 = tpu.matmul %0, %231, %cst_49 {dimension_numbers = #tpu.dot_dimension_numbers<[1], [0], [0], [1], [0, 0, 1, 1], [], []>} : vector<72x32xbf16>, vector<32x256xbf16>, vector<72x256xf32> -> vector<72x256xf32>
    %233 = vector.extract_strided_slice %232 {offsets = [0, 0], sizes = [8, 256], strides = [1, 1]} : vector<72x256xf32> to vector<8x256xf32>
    %234 = vector.extract_strided_slice %4 {offsets = [0, 0], sizes = [1, 256], strides = [1, 1]} : vector<8x256xf32> to vector<1x256xf32>
    %c17_i32_50 = arith.constant 17 : i32
    %235 = tpu.dynamic_rotate %233 by %c17_i32_50 dim 1 : vector<8x256xf32>, i32 -> vector<8x256xf32>
    %236 = vector.broadcast %234 : vector<1x256xf32> to vector<8x256xf32>
    %237 = arith.mulf %236, %235 : vector<8x256xf32>
    %238 = vector.extract_strided_slice %232 {offsets = [8, 0], sizes = [8, 256], strides = [1, 1]} : vector<72x256xf32> to vector<8x256xf32>
    %239 = vector.extract_strided_slice %4 {offsets = [1, 0], sizes = [1, 256], strides = [1, 1]} : vector<8x256xf32> to vector<1x256xf32>
    %c16_i32_51 = arith.constant 16 : i32
    %240 = tpu.dynamic_rotate %238 by %c16_i32_51 dim 1 : vector<8x256xf32>, i32 -> vector<8x256xf32>
    %241 = vector.broadcast %239 : vector<1x256xf32> to vector<8x256xf32>
    %242 = arith.mulf %241, %240 : vector<8x256xf32>
    %243 = arith.addf %237, %242 : vector<8x256xf32>
    %244 = vector.extract_strided_slice %232 {offsets = [16, 0], sizes = [8, 256], strides = [1, 1]} : vector<72x256xf32> to vector<8x256xf32>
    %245 = vector.extract_strided_slice %4 {offsets = [2, 0], sizes = [1, 256], strides = [1, 1]} : vector<8x256xf32> to vector<1x256xf32>
    %c15_i32_52 = arith.constant 15 : i32
    %246 = tpu.dynamic_rotate %244 by %c15_i32_52 dim 1 : vector<8x256xf32>, i32 -> vector<8x256xf32>
    %247 = vector.broadcast %245 : vector<1x256xf32> to vector<8x256xf32>
    %248 = arith.mulf %247, %246 : vector<8x256xf32>
    %249 = arith.addf %243, %248 : vector<8x256xf32>
    %250 = vector.extract_strided_slice %232 {offsets = [24, 0], sizes = [8, 256], strides = [1, 1]} : vector<72x256xf32> to vector<8x256xf32>
    %251 = vector.extract_strided_slice %4 {offsets = [3, 0], sizes = [1, 256], strides = [1, 1]} : vector<8x256xf32> to vector<1x256xf32>
    %c1_i32_53 = arith.constant 1 : i32
    %252 = tpu.dynamic_rotate %250 by %c1_i32_53 dim 1 : vector<8x256xf32>, i32 -> vector<8x256xf32>
    %253 = vector.broadcast %251 : vector<1x256xf32> to vector<8x256xf32>
    %254 = arith.mulf %253, %252 : vector<8x256xf32>
    %255 = arith.addf %249, %254 : vector<8x256xf32>
    %256 = vector.extract_strided_slice %232 {offsets = [32, 0], sizes = [8, 256], strides = [1, 1]} : vector<72x256xf32> to vector<8x256xf32>
    %257 = arith.addf %255, %256 : vector<8x256xf32>
    %258 = vector.extract_strided_slice %232 {offsets = [40, 0], sizes = [8, 256], strides = [1, 1]} : vector<72x256xf32> to vector<8x256xf32>
    %259 = vector.extract_strided_slice %4 {offsets = [4, 0], sizes = [1, 256], strides = [1, 1]} : vector<8x256xf32> to vector<1x256xf32>
    %c255_i32_54 = arith.constant 255 : i32
    %260 = tpu.dynamic_rotate %258 by %c255_i32_54 dim 1 : vector<8x256xf32>, i32 -> vector<8x256xf32>
    %261 = vector.broadcast %259 : vector<1x256xf32> to vector<8x256xf32>
    %262 = arith.mulf %261, %260 : vector<8x256xf32>
    %263 = arith.addf %257, %262 : vector<8x256xf32>
    %264 = vector.extract_strided_slice %232 {offsets = [48, 0], sizes = [8, 256], strides = [1, 1]} : vector<72x256xf32> to vector<8x256xf32>
    %265 = vector.extract_strided_slice %4 {offsets = [5, 0], sizes = [1, 256], strides = [1, 1]} : vector<8x256xf32> to vector<1x256xf32>
    %c241_i32_55 = arith.constant 241 : i32
    %266 = tpu.dynamic_rotate %264 by %c241_i32_55 dim 1 : vector<8x256xf32>, i32 -> vector<8x256xf32>
    %267 = vector.broadcast %265 : vector<1x256xf32> to vector<8x256xf32>
    %268 = arith.mulf %267, %266 : vector<8x256xf32>
    %269 = arith.addf %263, %268 : vector<8x256xf32>
    %270 = vector.extract_strided_slice %232 {offsets = [56, 0], sizes = [8, 256], strides = [1, 1]} : vector<72x256xf32> to vector<8x256xf32>
    %271 = vector.extract_strided_slice %4 {offsets = [6, 0], sizes = [1, 256], strides = [1, 1]} : vector<8x256xf32> to vector<1x256xf32>
    %c240_i32_56 = arith.constant 240 : i32
    %272 = tpu.dynamic_rotate %270 by %c240_i32_56 dim 1 : vector<8x256xf32>, i32 -> vector<8x256xf32>
    %273 = vector.broadcast %271 : vector<1x256xf32> to vector<8x256xf32>
    %274 = arith.mulf %273, %272 : vector<8x256xf32>
    %275 = arith.addf %269, %274 : vector<8x256xf32>
    %276 = vector.extract_strided_slice %232 {offsets = [64, 0], sizes = [8, 256], strides = [1, 1]} : vector<72x256xf32> to vector<8x256xf32>
    %277 = vector.extract_strided_slice %4 {offsets = [7, 0], sizes = [1, 256], strides = [1, 1]} : vector<8x256xf32> to vector<1x256xf32>
    %c239_i32_57 = arith.constant 239 : i32
    %278 = tpu.dynamic_rotate %276 by %c239_i32_57 dim 1 : vector<8x256xf32>, i32 -> vector<8x256xf32>
    %279 = vector.broadcast %277 : vector<1x256xf32> to vector<8x256xf32>
    %280 = arith.mulf %279, %278 : vector<8x256xf32>
    %281 = arith.addf %275, %280 : vector<8x256xf32>
    %282 = vector.broadcast %2 : vector<8x1xf32> to vector<8x256xf32>
    %283 = arith.addf %281, %282 : vector<8x256xf32>
    %cst_58 = arith.constant dense<0.000000e+00> : vector<256xf32>
    %284 = vector.multi_reduction <add>, %283, %cst_58 [0] : vector<8x256xf32> to vector<256xf32>
    %285 = vector.shape_cast %284 : vector<256xf32> to vector<1x256xf32>
    %cst_59 = arith.constant 8.000000e+00 : f32
    %286 = vector.broadcast %cst_59 : f32 to vector<1x256xf32>
    %287 = arith.divf %285, %286 : vector<1x256xf32>
    %288 = vector.broadcast %5 : f32 to vector<1x256xf32>
    %289 = arith.mulf %287, %288 : vector<1x256xf32>
    %290 = vector.broadcast %6 : f32 to vector<1x256xf32>
    %291 = arith.addf %289, %290 : vector<1x256xf32>
    %cst_60 = arith.constant 0.000000e+00 : f32
    %292 = vector.broadcast %cst_60 : f32 to vector<1x256xf32>
    %293 = arith.maximumf %291, %292 : vector<1x256xf32>
    %cst_61 = arith.constant 0.000000e+00 : f32
    %294 = vector.broadcast %cst_61 : f32 to vector<1x256xf32>
    %295 = vector.extract_strided_slice %4 {offsets = [0, 0], sizes = [1, 256], strides = [1, 1]} : vector<8x256xf32> to vector<1x256xf32>
    %c17_i32_62 = arith.constant 17 : i32
    %296 = tpu.dynamic_rotate %293 by %c17_i32_62 dim 1 : vector<1x256xf32>, i32 -> vector<1x256xf32>
    %297 = arith.mulf %295, %296 : vector<1x256xf32>
    %298 = vector.broadcast %8 : f32 to vector<1x256xf32>
    %299 = arith.mulf %297, %298 : vector<1x256xf32>
    %300 = arith.addf %294, %299 : vector<1x256xf32>
    %301 = vector.extract_strided_slice %4 {offsets = [1, 0], sizes = [1, 256], strides = [1, 1]} : vector<8x256xf32> to vector<1x256xf32>
    %c16_i32_63 = arith.constant 16 : i32
    %302 = tpu.dynamic_rotate %293 by %c16_i32_63 dim 1 : vector<1x256xf32>, i32 -> vector<1x256xf32>
    %303 = arith.mulf %301, %302 : vector<1x256xf32>
    %304 = vector.broadcast %9 : f32 to vector<1x256xf32>
    %305 = arith.mulf %303, %304 : vector<1x256xf32>
    %306 = arith.addf %300, %305 : vector<1x256xf32>
    %307 = vector.extract_strided_slice %4 {offsets = [2, 0], sizes = [1, 256], strides = [1, 1]} : vector<8x256xf32> to vector<1x256xf32>
    %c15_i32_64 = arith.constant 15 : i32
    %308 = tpu.dynamic_rotate %293 by %c15_i32_64 dim 1 : vector<1x256xf32>, i32 -> vector<1x256xf32>
    %309 = arith.mulf %307, %308 : vector<1x256xf32>
    %310 = vector.broadcast %10 : f32 to vector<1x256xf32>
    %311 = arith.mulf %309, %310 : vector<1x256xf32>
    %312 = arith.addf %306, %311 : vector<1x256xf32>
    %313 = vector.extract_strided_slice %4 {offsets = [3, 0], sizes = [1, 256], strides = [1, 1]} : vector<8x256xf32> to vector<1x256xf32>
    %c1_i32_65 = arith.constant 1 : i32
    %314 = tpu.dynamic_rotate %293 by %c1_i32_65 dim 1 : vector<1x256xf32>, i32 -> vector<1x256xf32>
    %315 = arith.mulf %313, %314 : vector<1x256xf32>
    %316 = vector.broadcast %11 : f32 to vector<1x256xf32>
    %317 = arith.mulf %315, %316 : vector<1x256xf32>
    %318 = arith.addf %312, %317 : vector<1x256xf32>
    %319 = vector.broadcast %12 : f32 to vector<1x256xf32>
    %320 = arith.mulf %293, %319 : vector<1x256xf32>
    %321 = arith.addf %318, %320 : vector<1x256xf32>
    %322 = vector.extract_strided_slice %4 {offsets = [4, 0], sizes = [1, 256], strides = [1, 1]} : vector<8x256xf32> to vector<1x256xf32>
    %c255_i32_66 = arith.constant 255 : i32
    %323 = tpu.dynamic_rotate %293 by %c255_i32_66 dim 1 : vector<1x256xf32>, i32 -> vector<1x256xf32>
    %324 = arith.mulf %322, %323 : vector<1x256xf32>
    %325 = vector.broadcast %13 : f32 to vector<1x256xf32>
    %326 = arith.mulf %324, %325 : vector<1x256xf32>
    %327 = arith.addf %321, %326 : vector<1x256xf32>
    %328 = vector.extract_strided_slice %4 {offsets = [5, 0], sizes = [1, 256], strides = [1, 1]} : vector<8x256xf32> to vector<1x256xf32>
    %c241_i32_67 = arith.constant 241 : i32
    %329 = tpu.dynamic_rotate %293 by %c241_i32_67 dim 1 : vector<1x256xf32>, i32 -> vector<1x256xf32>
    %330 = arith.mulf %328, %329 : vector<1x256xf32>
    %331 = vector.broadcast %14 : f32 to vector<1x256xf32>
    %332 = arith.mulf %330, %331 : vector<1x256xf32>
    %333 = arith.addf %327, %332 : vector<1x256xf32>
    %334 = vector.extract_strided_slice %4 {offsets = [6, 0], sizes = [1, 256], strides = [1, 1]} : vector<8x256xf32> to vector<1x256xf32>
    %c240_i32_68 = arith.constant 240 : i32
    %335 = tpu.dynamic_rotate %293 by %c240_i32_68 dim 1 : vector<1x256xf32>, i32 -> vector<1x256xf32>
    %336 = arith.mulf %334, %335 : vector<1x256xf32>
    %337 = vector.broadcast %15 : f32 to vector<1x256xf32>
    %338 = arith.mulf %336, %337 : vector<1x256xf32>
    %339 = arith.addf %333, %338 : vector<1x256xf32>
    %340 = vector.extract_strided_slice %4 {offsets = [7, 0], sizes = [1, 256], strides = [1, 1]} : vector<8x256xf32> to vector<1x256xf32>
    %c239_i32_69 = arith.constant 239 : i32
    %341 = tpu.dynamic_rotate %293 by %c239_i32_69 dim 1 : vector<1x256xf32>, i32 -> vector<1x256xf32>
    %342 = arith.mulf %340, %341 : vector<1x256xf32>
    %343 = vector.broadcast %16 : f32 to vector<1x256xf32>
    %344 = arith.mulf %342, %343 : vector<1x256xf32>
    %345 = arith.addf %339, %344 : vector<1x256xf32>
    %346 = vector.broadcast %7 : f32 to vector<1x256xf32>
    %347 = arith.addf %345, %346 : vector<1x256xf32>
    %348 = arith.negf %347 : vector<1x256xf32>
    %349 = math.exp %348 : vector<1x256xf32>
    %cst_70 = arith.constant 1.000000e+00 : f32
    %350 = vector.broadcast %cst_70 : f32 to vector<1x256xf32>
    %351 = arith.addf %350, %349 : vector<1x256xf32>
    %352 = arith.divf %350, %351 : vector<1x256xf32>
    %353 = vector.broadcast %352 : vector<1x256xf32> to vector<8x256xf32>
    %354 = arith.addf %283, %353 : vector<8x256xf32>
    %355 = arith.truncf %354 : vector<8x256xf32> to vector<8x256xbf16>
    %cst_71 = arith.constant dense<0.000000e+00> : vector<72x256xf32>
    %356 = tpu.matmul %1, %355, %cst_71 {dimension_numbers = #tpu.dot_dimension_numbers<[1], [0], [0], [1], [0, 0, 1, 1], [], []>} : vector<72x8xbf16>, vector<8x256xbf16>, vector<72x256xf32> -> vector<72x256xf32>
    %357 = vector.extract_strided_slice %356 {offsets = [0, 0], sizes = [8, 256], strides = [1, 1]} : vector<72x256xf32> to vector<8x256xf32>
    %358 = vector.extract_strided_slice %4 {offsets = [0, 0], sizes = [1, 256], strides = [1, 1]} : vector<8x256xf32> to vector<1x256xf32>
    %c17_i32_72 = arith.constant 17 : i32
    %359 = tpu.dynamic_rotate %357 by %c17_i32_72 dim 1 : vector<8x256xf32>, i32 -> vector<8x256xf32>
    %360 = vector.broadcast %358 : vector<1x256xf32> to vector<8x256xf32>
    %361 = arith.mulf %360, %359 : vector<8x256xf32>
    %362 = vector.extract_strided_slice %356 {offsets = [8, 0], sizes = [8, 256], strides = [1, 1]} : vector<72x256xf32> to vector<8x256xf32>
    %363 = vector.extract_strided_slice %4 {offsets = [1, 0], sizes = [1, 256], strides = [1, 1]} : vector<8x256xf32> to vector<1x256xf32>
    %c16_i32_73 = arith.constant 16 : i32
    %364 = tpu.dynamic_rotate %362 by %c16_i32_73 dim 1 : vector<8x256xf32>, i32 -> vector<8x256xf32>
    %365 = vector.broadcast %363 : vector<1x256xf32> to vector<8x256xf32>
    %366 = arith.mulf %365, %364 : vector<8x256xf32>
    %367 = arith.addf %361, %366 : vector<8x256xf32>
    %368 = vector.extract_strided_slice %356 {offsets = [16, 0], sizes = [8, 256], strides = [1, 1]} : vector<72x256xf32> to vector<8x256xf32>
    %369 = vector.extract_strided_slice %4 {offsets = [2, 0], sizes = [1, 256], strides = [1, 1]} : vector<8x256xf32> to vector<1x256xf32>
    %c15_i32_74 = arith.constant 15 : i32
    %370 = tpu.dynamic_rotate %368 by %c15_i32_74 dim 1 : vector<8x256xf32>, i32 -> vector<8x256xf32>
    %371 = vector.broadcast %369 : vector<1x256xf32> to vector<8x256xf32>
    %372 = arith.mulf %371, %370 : vector<8x256xf32>
    %373 = arith.addf %367, %372 : vector<8x256xf32>
    %374 = vector.extract_strided_slice %356 {offsets = [24, 0], sizes = [8, 256], strides = [1, 1]} : vector<72x256xf32> to vector<8x256xf32>
    %375 = vector.extract_strided_slice %4 {offsets = [3, 0], sizes = [1, 256], strides = [1, 1]} : vector<8x256xf32> to vector<1x256xf32>
    %c1_i32_75 = arith.constant 1 : i32
    %376 = tpu.dynamic_rotate %374 by %c1_i32_75 dim 1 : vector<8x256xf32>, i32 -> vector<8x256xf32>
    %377 = vector.broadcast %375 : vector<1x256xf32> to vector<8x256xf32>
    %378 = arith.mulf %377, %376 : vector<8x256xf32>
    %379 = arith.addf %373, %378 : vector<8x256xf32>
    %380 = vector.extract_strided_slice %356 {offsets = [32, 0], sizes = [8, 256], strides = [1, 1]} : vector<72x256xf32> to vector<8x256xf32>
    %381 = arith.addf %379, %380 : vector<8x256xf32>
    %382 = vector.extract_strided_slice %356 {offsets = [40, 0], sizes = [8, 256], strides = [1, 1]} : vector<72x256xf32> to vector<8x256xf32>
    %383 = vector.extract_strided_slice %4 {offsets = [4, 0], sizes = [1, 256], strides = [1, 1]} : vector<8x256xf32> to vector<1x256xf32>
    %c255_i32_76 = arith.constant 255 : i32
    %384 = tpu.dynamic_rotate %382 by %c255_i32_76 dim 1 : vector<8x256xf32>, i32 -> vector<8x256xf32>
    %385 = vector.broadcast %383 : vector<1x256xf32> to vector<8x256xf32>
    %386 = arith.mulf %385, %384 : vector<8x256xf32>
    %387 = arith.addf %381, %386 : vector<8x256xf32>
    %388 = vector.extract_strided_slice %356 {offsets = [48, 0], sizes = [8, 256], strides = [1, 1]} : vector<72x256xf32> to vector<8x256xf32>
    %389 = vector.extract_strided_slice %4 {offsets = [5, 0], sizes = [1, 256], strides = [1, 1]} : vector<8x256xf32> to vector<1x256xf32>
    %c241_i32_77 = arith.constant 241 : i32
    %390 = tpu.dynamic_rotate %388 by %c241_i32_77 dim 1 : vector<8x256xf32>, i32 -> vector<8x256xf32>
    %391 = vector.broadcast %389 : vector<1x256xf32> to vector<8x256xf32>
    %392 = arith.mulf %391, %390 : vector<8x256xf32>
    %393 = arith.addf %387, %392 : vector<8x256xf32>
    %394 = vector.extract_strided_slice %356 {offsets = [56, 0], sizes = [8, 256], strides = [1, 1]} : vector<72x256xf32> to vector<8x256xf32>
    %395 = vector.extract_strided_slice %4 {offsets = [6, 0], sizes = [1, 256], strides = [1, 1]} : vector<8x256xf32> to vector<1x256xf32>
    %c240_i32_78 = arith.constant 240 : i32
    %396 = tpu.dynamic_rotate %394 by %c240_i32_78 dim 1 : vector<8x256xf32>, i32 -> vector<8x256xf32>
    %397 = vector.broadcast %395 : vector<1x256xf32> to vector<8x256xf32>
    %398 = arith.mulf %397, %396 : vector<8x256xf32>
    %399 = arith.addf %393, %398 : vector<8x256xf32>
    %400 = vector.extract_strided_slice %356 {offsets = [64, 0], sizes = [8, 256], strides = [1, 1]} : vector<72x256xf32> to vector<8x256xf32>
    %401 = vector.extract_strided_slice %4 {offsets = [7, 0], sizes = [1, 256], strides = [1, 1]} : vector<8x256xf32> to vector<1x256xf32>
    %c239_i32_79 = arith.constant 239 : i32
    %402 = tpu.dynamic_rotate %400 by %c239_i32_79 dim 1 : vector<8x256xf32>, i32 -> vector<8x256xf32>
    %403 = vector.broadcast %401 : vector<1x256xf32> to vector<8x256xf32>
    %404 = arith.mulf %403, %402 : vector<8x256xf32>
    %405 = arith.addf %399, %404 : vector<8x256xf32>
    %406 = vector.broadcast %3 : vector<8x1xf32> to vector<8x256xf32>
    %407 = arith.addf %405, %406 : vector<8x256xf32>
    %408 = arith.negf %407 : vector<8x256xf32>
    %409 = math.exp %408 : vector<8x256xf32>
    %cst_80 = arith.constant 1.000000e+00 : f32
    %410 = vector.broadcast %cst_80 : f32 to vector<8x256xf32>
    %411 = arith.addf %410, %409 : vector<8x256xf32>
    %412 = arith.divf %410, %411 : vector<8x256xf32>
    %413 = vector.extract_strided_slice %230 {offsets = [0, 0], sizes = [8, 256], strides = [1, 1]} : vector<32x256xf32> to vector<8x256xf32>
    %414 = vector.extract_strided_slice %412 {offsets = [0, 0], sizes = [1, 256], strides = [1, 1]} : vector<8x256xf32> to vector<1x256xf32>
    %415 = vector.broadcast %414 : vector<1x256xf32> to vector<8x256xf32>
    %416 = arith.mulf %413, %415 : vector<8x256xf32>
    %c1_81 = arith.constant 1 : index
    %c0_82 = arith.constant 0 : index
    %c0_83 = arith.constant 0 : index
    %417 = vector.load %arg8[%c1_81, %c0_82, %c0_83] : memref<2x32x256xf32, #tpu.memory_space<vmem>>, vector<1x8x256xf32>
    %418 = vector.shape_cast %417 : vector<1x8x256xf32> to vector<8x256xf32>
    %419 = vector.shape_cast %416 : vector<8x256xf32> to vector<1x8x256xf32>
    tpu.vector_store %arg8[%c1_81, %c0_82, %c0_83], %419 {strides = array<i32>} : memref<2x32x256xf32, #tpu.memory_space<vmem>>, vector<1x8x256xf32>,
    %420 = vector.extract_strided_slice %230 {offsets = [8, 0], sizes = [8, 256], strides = [1, 1]} : vector<32x256xf32> to vector<8x256xf32>
    %421 = vector.extract_strided_slice %412 {offsets = [1, 0], sizes = [1, 256], strides = [1, 1]} : vector<8x256xf32> to vector<1x256xf32>
    %422 = vector.broadcast %421 : vector<1x256xf32> to vector<8x256xf32>
    %423 = arith.mulf %420, %422 : vector<8x256xf32>
    %c1_84 = arith.constant 1 : index
    %c8_85 = arith.constant 8 : index
    %c0_86 = arith.constant 0 : index
    %424 = vector.load %arg8[%c1_84, %c8_85, %c0_86] : memref<2x32x256xf32, #tpu.memory_space<vmem>>, vector<1x8x256xf32>
    %425 = vector.shape_cast %424 : vector<1x8x256xf32> to vector<8x256xf32>
    %426 = vector.shape_cast %423 : vector<8x256xf32> to vector<1x8x256xf32>
    tpu.vector_store %arg8[%c1_84, %c8_85, %c0_86], %426 {strides = array<i32>} : memref<2x32x256xf32, #tpu.memory_space<vmem>>, vector<1x8x256xf32>,
    %427 = vector.extract_strided_slice %230 {offsets = [16, 0], sizes = [8, 256], strides = [1, 1]} : vector<32x256xf32> to vector<8x256xf32>
    %428 = vector.extract_strided_slice %412 {offsets = [2, 0], sizes = [1, 256], strides = [1, 1]} : vector<8x256xf32> to vector<1x256xf32>
    %429 = vector.broadcast %428 : vector<1x256xf32> to vector<8x256xf32>
    %430 = arith.mulf %427, %429 : vector<8x256xf32>
    %c1_87 = arith.constant 1 : index
    %c16_88 = arith.constant 16 : index
    %c0_89 = arith.constant 0 : index
    %431 = vector.load %arg8[%c1_87, %c16_88, %c0_89] : memref<2x32x256xf32, #tpu.memory_space<vmem>>, vector<1x8x256xf32>
    %432 = vector.shape_cast %431 : vector<1x8x256xf32> to vector<8x256xf32>
    %433 = vector.shape_cast %430 : vector<8x256xf32> to vector<1x8x256xf32>
    tpu.vector_store %arg8[%c1_87, %c16_88, %c0_89], %433 {strides = array<i32>} : memref<2x32x256xf32, #tpu.memory_space<vmem>>, vector<1x8x256xf32>,
    %434 = vector.extract_strided_slice %230 {offsets = [24, 0], sizes = [8, 256], strides = [1, 1]} : vector<32x256xf32> to vector<8x256xf32>
    %435 = vector.extract_strided_slice %412 {offsets = [3, 0], sizes = [1, 256], strides = [1, 1]} : vector<8x256xf32> to vector<1x256xf32>
    %436 = vector.broadcast %435 : vector<1x256xf32> to vector<8x256xf32>
    %437 = arith.mulf %434, %436 : vector<8x256xf32>
    %c1_90 = arith.constant 1 : index
    %c24_91 = arith.constant 24 : index
    %c0_92 = arith.constant 0 : index
    %438 = vector.load %arg8[%c1_90, %c24_91, %c0_92] : memref<2x32x256xf32, #tpu.memory_space<vmem>>, vector<1x8x256xf32>
    %439 = vector.shape_cast %438 : vector<1x8x256xf32> to vector<8x256xf32>
    %440 = vector.shape_cast %437 : vector<8x256xf32> to vector<1x8x256xf32>
    tpu.vector_store %arg8[%c1_90, %c24_91, %c0_92], %440 {strides = array<i32>} : memref<2x32x256xf32, #tpu.memory_space<vmem>>, vector<1x8x256xf32>,
    return
  }
  func.func @transform_0(%arg0: i32) -> (i32, i32, i32) {
    %c0_i32 = arith.constant 0 : i32
    %c0_i32_0 = arith.constant 0 : i32
    %c0_i32_1 = arith.constant 0 : i32
    return %arg0, %c0_i32, %c0_i32_0 : i32, i32, i32
  }
  func.func @transform_1(%arg0: i32) -> (i32, i32) {
    %c0_i32 = arith.constant 0 : i32
    %c0_i32_0 = arith.constant 0 : i32
    %c0_i32_1 = arith.constant 0 : i32
    return %c0_i32, %c0_i32_0 : i32, i32
  }
  func.func @transform_2(%arg0: i32) -> (i32, i32) {
    %c0_i32 = arith.constant 0 : i32
    %c0_i32_0 = arith.constant 0 : i32
    %c0_i32_1 = arith.constant 0 : i32
    return %c0_i32, %c0_i32_0 : i32, i32
  }
  func.func @transform_3(%arg0: i32) -> i32 {
    %c0_i32 = arith.constant 0 : i32
    %c0_i32_0 = arith.constant 0 : i32
    return %c0_i32 : i32
  }
  func.func @transform_4(%arg0: i32) -> (i32, i32) {
    %c0_i32 = arith.constant 0 : i32
    %c0_i32_0 = arith.constant 0 : i32
    %c0_i32_1 = arith.constant 0 : i32
    return %c0_i32, %c0_i32_0 : i32, i32
  }
  func.func @transform_5(%arg0: i32) -> (i32, i32) {
    %c0_i32 = arith.constant 0 : i32
    %c0_i32_0 = arith.constant 0 : i32
    %c0_i32_1 = arith.constant 0 : i32
    return %c0_i32, %c0_i32_0 : i32, i32
  }
  func.func @transform_6(%arg0: i32) -> (i32, i32) {
    %c0_i32 = arith.constant 0 : i32
    %c0_i32_0 = arith.constant 0 : i32
    %c0_i32_1 = arith.constant 0 : i32
    return %c0_i32, %c0_i32_0 : i32, i32
  }
  func.func @transform_7(%arg0: i32) -> (i32, i32, i32) {
    %c0_i32 = arith.constant 0 : i32
    %c0_i32_0 = arith.constant 0 : i32
    %c0_i32_1 = arith.constant 0 : i32
    return %arg0, %c0_i32, %c0_i32_0 : i32, i32, i32
  }
}

</mosaic_0001>

<bundles_post_ra>
// kernel: tpu_custom_call.1
= control target key start
LH: loop header
LB: loop body
LE: loop exit
PB: predicated region body
PF: predicated region fallthrough
CT: control target
= control target key end

     0   :  { %12 = vsyncpa [#allocation3], 0  ;;  %s2675_s0 = inlined_call_operand.hbm [shape: f32[2,32,256], index: 0, kind: input, shape index: {}]   ;;  %s2676_s1 = inlined_call_operand.vmem [shape: bf16[72,32], index: 1, kind: input, shape index: {}]   ;;  %s2677_s2 = inlined_call_operand.vmem [shape: f32[8,1], index: 2, kind: input, shape index: {}]   ;;  %s2678_s3 = inlined_call_operand.vmem [shape: f32[12], index: 3, kind: input, shape index: {}]   ;;  %s2679_s4 = inlined_call_operand.vmem [shape: f32[8,256], index: 4, kind: input, shape index: {}]   ;;  %s2680_s5 = inlined_call_operand.vmem [shape: bf16[72,8], index: 5, kind: input, shape index: {}]   ;;  %s2681_s6 = inlined_call_operand.vmem [shape: f32[8,1], index: 6, kind: input, shape index: {}]   ;;  %s2682_s7 = inlined_call_operand.hbm [shape: f32[2,32,256], index: 7, kind: output, shape index: {}]  }
   0x1   :  { %13 = vsyncpa [#allocation5], 0 }
   0x2   :  { %14 = vsyncpa [#allocation4], 0  ;;  %s1740_s24 = smov [#allocation2]   ;;  %s37_s28 = sshll.u32 %s2678_s3, 4  ;;  %s38_s28 = int_to_ptr.vmem [resolvable:$true] %s37_s28 }
   0x3   :  { %s20_s25 = sshll.u32 %s1740_s24, 4  ;;  %s1678_s8 = scalar_lea.hbm %s2675_s0, 2048  ;;  %s21_s25 = int_to_ptr.vmem [resolvable:$true] %s20_s25 }
   0x4   :  { %p1679_p0 = scmp.ne.s32.totalorder %s2675_s0, %s1678_s8  ;;  %p1682_p1 = scmp.lt.u32.totalorder %s1678_s8, %s2675_s0 }
   0x6   :  { %p1684_p2 = pnand %p1682_p1, %p1679_p0 }
   0x8   :  { %1687 = shalt.err (!%p1684_p2)
}
   0x9   :  { %s1688_s13 = scalar_lea.vmem %s21_s25, 2048  ;;  %p1693_p4 = scmp.lt.s32.totalorder %s21_s25, %s21_s25 }
   0xa   :  { %p1689_p3 = scmp.ne.s32.totalorder %s21_s25, %s1688_s13  ;;  %p1694_p5 = scmp.lt.s32.totalorder %s1688_s13, %s1688_s13 }
   0xc   :  { %p1695_p6 = por %p1694_p5, %p1693_p4 }
   0xe   :  { %p1696_p7 = pnand %p1695_p6, %p1689_p3 }
  0x10   :  { %1699 = shalt.err (!%p1696_p7)
}
  0x11   :  { %s1741_s3 = smov 256   ;;  %s1742_s14 = smov 16  }
  0x12   :  { %26 = dma.hbm_to_vmem [thread:$0]  %s2675_s0, 2048, %s21_s25, [#allocation3], %s1741_s3, %s1741_s3, %s1742_s14  }
  0x13   :  { %s1700_s17 = scalar_lea.vmem %s38_s28, 16  ;;  %p1705_p9 = scmp.lt.s32.totalorder %s38_s28, %s38_s28 }
  0x14   :  { %p1701_p8 = scmp.ne.s32.totalorder %s38_s28, %s1700_s17  ;;  %p1706_p10 = scmp.lt.s32.totalorder %s1700_s17, %s1700_s17 }
  0x16   :  { %p1707_p11 = por %p1706_p10, %p1705_p9 }
  0x18   :  { %p1708_p12 = pnand %p1707_p11, %p1701_p8 }
  0x1a   :  { %1711 = shalt.err (!%p1708_p12)
}
  0x1b   :  { %s1743_s18 = smov [#allocation6]  }
  0x1c   :  { %40 = dma.vmem_to_smem %s38_s28, 16, %s1743_s18, [#allocation5]  }
  0x1d   :  { %1734 = dma.done.wait [#allocation3], 2048  }
  0x1e   :  { %1735 = vsyncadd [#allocation3], 4294965248 }
  0x1f   :  { %1736 = dma.done.wait [#allocation5], 16  }
  0x20   :  { %1737 = vsyncadd [#allocation5], 4294967280 }
  0x21   :  { %53 = sfence }
  0x22   :  { %v90_v0 = vld [vmem:[#allocation2 + $0x8] sm:$0xff]  ;;  %v92_v1 = vld [vmem:[#allocation2 + $0x18] sm:$0xff]  ;;  %v89_v2 = vld [vmem:[#allocation2] sm:$0xff]  ;;  %v2683_v7 = vmov 0   ;;  %vm124_vm0 = vcmask 261120   ;;  %s1745_s28 = smov 17   ;;  %v225_v41 = vlaneseq }
  0x23   :  { %v98_v3 = vpack.c.bf16 %v92_v1, %v90_v0  ;;  %v91_v4 = vld [vmem:[#allocation2 + $0x10] sm:$0xff]  ;;  %v94_v5 = vld [vmem:[#allocation2 + $0x28] sm:$0xff]  ;;  %v96_v6 = vld [vmem:[#allocation2 + $0x38] sm:$0xff]  ;;  %172 = vmatprep.mubr.bf16.mxu0 %v2683_v7  ;;  %1617 = vset.pattern.permute.xlu0 %v2683_v7  ;;  %s1747_s29 = smov 1   ;;  %s1748_s30 = smov 127   ;;  %vm664_vm9 = vcmask 1043456  }
  0x24   :  { %v97_v8 = vpack.c.bf16 %v91_v4, %v89_v2  ;;  %v100_v9 = vpack.c.bf16 %v96_v6, %v94_v5  ;;  %v93_v10 = vld [vmem:[#allocation2 + $0x20] sm:$0xff]  ;;  %v95_v11 = vld [vmem:[#allocation2 + $0x30] sm:$0xff]  ;;  %703 = vmatprep.mubr.bf16.mxu1 %v2683_v7  ;;  %v1825_v14 = vld [vmem:[%s2676_s1 + $0x8] sm:$0xff]   ;;  %s1749_s8 = smov 113   ;;  %s1750_s9 = smov 112   ;;  %v1877_v44 = vshrl.u32 %v225_v41, 7 }
  0x25   :  { %140 = vmatprep.subr.bf16.mxu0 %v98_v3  ;;  %v99_v12 = vpack.c.bf16 %v95_v11, %v93_v10  ;;  %v1817_v13 = vld [vmem:[%s2676_s1] sm:$0xff]   ;;  %v1833_v15 = vld [vmem:[%s2676_s1 + $0x10] sm:$0xff]   ;;  %v1841_v16 = vld [vmem:[%s2676_s1 + $0x18] sm:$0xff]   ;;  %s1751_s12 = smov 111   ;;  %v1879_v46 = vand.u32 127, %v225_v41  ;;  %s77_s17 = sld [smem:[#allocation6]] }
  0x26   :  { %141 = vmatpush1.bf16.msra.mxu0 %v97_v8  ;;  %v1849_v17 = vld [vmem:[%s2676_s1 + $0x20] ss:$0 sps:$4 sm:$0xff]   ;;  %s1746_s1 = smov 15   ;;  %v1882_v47 = vsub.s32 1, %v1877_v44  ;;  %v1885_v49 = vsub.s32 0, %v1877_v44  ;;  %v1894_v51 = vsub.s32 2, %v1877_v44 }
  0x27   :  { %142 = vmatprep.subr.bf16.mxu0 %v100_v9  ;;  %v73_v34 = vld [vmem:[%s2677_s2] sm:$0xff]  ;;  %vm244_vm1 = vcmp.lt.s32.totalorder %v1879_v46, 16  ;;  %v1899_v52 = vld [vmem:[%s2679_s4 + $0x8] sm:$0xff]  ;;  %vm227_vm2 = vcmp.lt.s32.totalorder %v1879_v46, 17  ;;  %vm263_vm3 = vcmp.lt.s32.totalorder %v1879_v46, 15  ;;  %v1912_v56 = vsub.s32 3, %v1877_v44 }
  0x28   :  { %2715 = vst [vmem:[#allocation11_spill] sm:$0xff] %v1882_v47  ;;  %2716 = vst [vmem:[#allocation12_spill] sm:$0xff] %v1885_v49  ;;  %v1890_v50 = vld [vmem:[%s2679_s4] sm:$0xff]  ;;  %v1908_v55 = vrot.slane %v1899_v52, %v1882_v47  ;;  %v1924_v60 = vrot.slane %v1899_v52, %v1885_v49  ;;  %v1932_v62 = vrot.slane %v1899_v52, %v1894_v51  ;;  %vm282_vm4 = vcmp.lt.s32.totalorder %v1879_v46, 1  ;;  %s1553_s18 = sld [smem:[#allocation6 + $0x1]]  ;;  %s1556_s0 = sld [smem:[#allocation6 + $0x4]] }
  0x29   :  { %2717 = vst [vmem:[#allocation13_spill] sm:$0xff] %v1894_v51  ;;  %v1904_v54 = vrot.slane %v1890_v50, %v1882_v47  ;;  %2720 = vst [vmem:[#allocation16_spill] sm:$0xff] %v1912_v56  ;;  %v1916_v57 = vrot.slane %v1890_v50, %v1885_v49  ;;  %v1928_v61 = vrot.slane %v1890_v50, %v1894_v51  ;;  %vm303_vm5 = vcmp.lt.s32.totalorder %v1879_v46, 127  ;;  %s1555_s19 = sld [smem:[#allocation6 + $0x3]]  ;;  %s1557_s20 = sld [smem:[#allocation6 + $0x5]] }
  0x2a   :  { %143 = vmatpush1.bf16.msra.mxu0 %v99_v12  ;;  %2719 = vst [vmem:[#allocation15_spill] sm:$0xff] %v1908_v55  ;;  %v1947_v6 = vrot.slane %v1890_v50, %v1912_v56  ;;  %v1951_v8 = vrot.slane %v1899_v52, %v1912_v56  ;;  %vm322_vm6 = vcmp.lt.s32.totalorder %v1879_v46, 113  ;;  %v346_v41 = vsub.s32 6, %v1877_v44  ;;  %s1558_s21 = sld [smem:[#allocation6 + $0x6]]  ;;  %s2103_s22 = sld [smem:[#allocation6 + $0x8]] }
  0x2b   :  { %2718 = vst [vmem:[#allocation14_spill] sm:$0xff] %v1904_v54  ;;  %vm341_vm7 = vcmp.lt.s32.totalorder %v1879_v46, 112  ;;  %vm360_vm8 = vcmp.lt.s32.totalorder %v1879_v46, 111  ;;  %s1559_s23 = sld [smem:[#allocation6 + $0x7]]  ;;  %s2117_s24 = sld [smem:[#allocation6 + $0x9]]  ;;  %vm648_vm10 = vcmask 64512  }
  0x2c   :  { %s2119_s25 = sld [smem:[#allocation6 + $0xa]]  ;;  %s2140_s26 = sld [smem:[#allocation6 + $0xb]] }
  0x2d   :  { %1569 = vmatmul.mubr.msk.bf16.vlgmr.msra.gmra.mrb[0].mxu0 %vm124_vm0, %v1817_v13  ;;  %s1554_s27 = sld [smem:[#allocation6 + $0x2]] }
  0x2e   :  { %182 = vmatprep.mubr.bf16.mxu0 %v2683_v7 }
  0x35   :  { %1570 = vmatmul.mubr.msk.bf16.gmra.mrb[4].mxu0 %vm124_vm0, %v1825_v14 }
  0x36   :  { %192 = vmatprep.mubr.bf16.mxu0 %v2683_v7 }
  0x3d   :  { %1571 = vmatmul.mubr.msk.bf16.gmra.mrb[8].mxu0 %vm124_vm0, %v1833_v15 }
  0x3e   :  { %202 = vmatprep.mubr.bf16.mxu0 %v2683_v7 }
  0x45   :  { %1572 = vmatmul.mubr.msk.bf16.gmra.mrb[12].mxu0 %vm124_vm0, %v1841_v16 }
  0x46   :  { %212 = vmatprep.mubr.bf16.mxu0 %v2683_v7 }
  0x4d   :  { %1573 = vmatmul.mubr.msk.bf16.gmra.mrb[16].mxu0 %vm124_vm0, %v1849_v17 }
  0x4e   :  { %1343 = vmatprep.mubr.bf16.mxu0 %v2683_v7 }
 0x100   :  { %v174_v18 = vpop.f32.mrb[0].mxu0 }
 0x101   :  { %221 = vrot.lane.b32.xlu0 %v174_v18, %s1745_s28  ;;  %v176_v19 = vpop.f32.mrb[1].mxu0 }
 0x102   :  { %v178_v20 = vpop.f32.mrb[2].mxu0 }
 0x103   :  { %240 = vrot.lane.b32.xlu1 %v178_v20, %s1742_s14  ;;  %v180_v21 = vpop.f32.mrb[3].mxu0 }
 0x105   :  { %223 = vrot.lane.b32.xlu0 %v176_v19, %s1745_s28 }
 0x107   :  { %242 = vrot.lane.b32.xlu1 %v180_v21, %s1742_s14 }
 0x108   :  { %v184_v22 = vpop.f32.mrb[4].mxu0 }
 0x109   :  { %259 = vrot.lane.b32.xlu0 %v184_v22, %s1746_s1  ;;  %v186_v23 = vpop.f32.mrb[5].mxu0 }
 0x10a   :  { %v188_v24 = vpop.f32.mrb[6].mxu0 }
 0x10b   :  { %261 = vrot.lane.b32.xlu1 %v186_v23, %s1746_s1  ;;  %v190_v25 = vpop.f32.mrb[7].mxu0 }
 0x10d   :  { %278 = vrot.lane.b32.xlu0 %v188_v24, %s1747_s29 }
 0x10f   :  { %280 = vrot.lane.b32.xlu1 %v190_v25, %s1747_s29 }
 0x110   :  { %v1862_v26 = vpop.f32.mrb[8].mxu0 }
 0x111   :  { %v1864_v27 = vpop.f32.mrb[9].mxu0 }
 0x112   :  { %v198_v28 = vpop.f32.mrb[10].mxu0 }
 0x113   :  { %299 = vrot.lane.b32.xlu0 %v198_v28, %s1748_s30  ;;  %v200_v29 = vpop.f32.mrb[11].mxu0  ;;  %v308_v28 = vsub.s32 4, %v1877_v44 }
 0x114   :  { %301 = vrot.lane.b32.xlu1 %v200_v29, %s1748_s30 }
 0x118   :  { %v204_v30 = vpop.f32.mrb[12].mxu0 }
 0x119   :  { %318 = vrot.lane.b32.xlu0 %v204_v30, %s1749_s8  ;;  %v206_v31 = vpop.f32.mrb[13].mxu0 }
 0x11a   :  { %320 = vrot.lane.b32.xlu1 %v206_v31, %s1749_s8  ;;  %v208_v32 = vpop.f32.mrb[14].mxu0 }
 0x11b   :  { %v210_v33 = vpop.f32.mrb[15].mxu0 }
 0x11d   :  { %337 = vrot.lane.b32.xlu0 %v208_v32, %s1750_s9 }
 0x11e   :  { %339 = vrot.lane.b32.xlu1 %v210_v33, %s1750_s9  ;;  %v327_v33 = vsub.s32 5, %v1877_v44 }
 0x120   :  { %v214_v35 = vpop.f32.mrb[16].mxu0 }
 0x121   :  { %377 = vperm.xlu0 %1617, %v73_v34   ;;  %v216_v36 = vpop.f32.mrb[17].mxu0 }
 0x122   :  { %356 = vrot.lane.b32.xlu1 %v214_v35, %s1751_s12  ;;  %v218_v37 = vpop.f32.mrb[18].mxu0 }
 0x123   :  { %v219_v38 = vpop.f32.mrb[19].mxu0  ;;  %v1970_v37 = vrot.slane %v1899_v52, %v308_v28 }
 0x126   :  { %358 = vrot.lane.b32.xlu1 %v216_v36, %s1751_s12  ;;  %v1967_v36 = vrot.slane %v1890_v50, %v308_v28 }
 0x173   :  { %v222_v39 = vpop.permute.xlu0 %221 }
 0x175   :  { %v241_v40 = vpop.permute.xlu1 %240 }
 0x177   :  { %v224_v42 = vpop.permute.xlu0 %223 }
 0x178   :  { %v228_v0 = vsel %vm227_vm2, %v222_v39, %v224_v42  ;;  %v229_v1 = vsel %vm227_vm2, %v224_v42, %v222_v39  ;;  %v1979_v42 = vrot.slane %v1890_v50, %v327_v33 }
 0x179   :  { %v243_v43 = vpop.permute.xlu1 %242  ;;  %v238_v12 = vmul.f32 %v1916_v57, %v229_v1  ;;  %v239_v18 = vmul.f32 %v1924_v60, %v228_v0 }
 0x17a   :  { %v245_v58 = vsel %vm244_vm1, %v241_v40, %v243_v43  ;;  %v246_v59 = vsel %vm244_vm1, %v243_v43, %v241_v40  ;;  %v1982_v43 = vrot.slane %v1899_v52, %v327_v33 }
 0x17b   :  { %v260_v48 = vpop.permute.xlu0 %259  ;;  %v255_v4 = vmul.f32 %v1904_v54, %v246_v59  ;;  %v256_v5 = vmul.f32 %v1908_v55, %v245_v58  ;;  %v365_v58 = vsub.s32 7, %v1877_v44 }
 0x17d   :  { %v262_v45 = vpop.permute.xlu1 %261  ;;  %v257_v22 = vadd.f32 %v255_v4, %v238_v12  ;;  %v258_v23 = vadd.f32 %v256_v5, %v239_v18 }
 0x17e   :  { %v264_v2 = vsel %vm263_vm3, %v260_v48, %v262_v45  ;;  %v265_v3 = vsel %vm263_vm3, %v262_v45, %v260_v48 }
 0x17f   :  { %v279_v63 = vpop.permute.xlu0 %278  ;;  %v274_v19 = vmul.f32 %v1928_v61, %v265_v3  ;;  %v275_v20 = vmul.f32 %v1932_v62, %v264_v2 }
 0x181   :  { %v281_v53 = vpop.permute.xlu1 %280  ;;  %v276_v30 = vadd.f32 %v274_v19, %v257_v22  ;;  %v277_v31 = vadd.f32 %v275_v20, %v258_v23 }
 0x182   :  { %v283_v9 = vsel %vm282_vm4, %v279_v63, %v281_v53  ;;  %v284_v10 = vsel %vm282_vm4, %v281_v53, %v279_v63 }
 0x183   :  { %v293_v24 = vmul.f32 %v1947_v6, %v284_v10  ;;  %v294_v25 = vmul.f32 %v1951_v8, %v283_v9  ;;  %v2008_v9 = vrot.slane %v1890_v50, %v365_v58  ;;  %v2011_v10 = vrot.slane %v1899_v52, %v365_v58 }
 0x185   :  { %v300_v21 = vpop.permute.xlu0 %299  ;;  %v295_v34 = vadd.f32 %v293_v24, %v276_v30  ;;  %v296_v35 = vadd.f32 %v294_v25, %v277_v31 }
 0x186   :  { %v302_v11 = vpop.permute.xlu1 %301 }
 0x187   :  { %v304_v39 = vsel %vm303_vm5, %v300_v21, %v302_v11  ;;  %v305_v40 = vsel %vm303_vm5, %v302_v11, %v300_v21  ;;  %v297_v45 = vadd.f32 %v295_v34, %v1862_v26  ;;  %v298_v48 = vadd.f32 %v296_v35, %v1864_v27 }
 0x188   :  { %v314_v59 = vmul.f32 %v1967_v36, %v304_v39  ;;  %v315_v63 = vmul.f32 %v1970_v37, %v305_v40  ;;  %v1995_v26 = vrot.slane %v1890_v50, %v346_v41  ;;  %v1998_v27 = vrot.slane %v1899_v52, %v346_v41 }
 0x18a   :  { %v316_v11 = vadd.f32 %v314_v59, %v297_v45  ;;  %v317_v12 = vadd.f32 %v315_v63, %v298_v48 }
 0x18b   :  { %v319_v32 = vpop.permute.xlu0 %318 }
 0x18c   :  { %v321_v29 = vpop.permute.xlu1 %320 }
 0x18d   :  { %v323_v0 = vsel %vm322_vm6, %v319_v32, %v321_v29  ;;  %v324_v1 = vsel %vm322_vm6, %v321_v29, %v319_v32 }
 0x18e   :  { %v333_v4 = vmul.f32 %v1979_v42, %v323_v0  ;;  %v334_v5 = vmul.f32 %v1982_v43, %v324_v1 }
 0x18f   :  { %v338_v53 = vpop.permute.xlu0 %337 }
 0x190   :  { %v340_v38 = vpop.permute.xlu1 %339  ;;  %v335_v23 = vadd.f32 %v333_v4, %v316_v11  ;;  %v336_v24 = vadd.f32 %v334_v5, %v317_v12  ;;  %v2035_v4 = vstv %s1553_s18 }
 0x191   :  { %v342_v44 = vsel %vm341_vm7, %v338_v53, %v340_v38  ;;  %v343_v3 = vsel %vm341_vm7, %v340_v38, %v338_v53 }
 0x192   :  { %v352_v19 = vmul.f32 %v1995_v26, %v342_v44  ;;  %v353_v20 = vmul.f32 %v1998_v27, %v343_v3 }
 0x194   :  { %v357_v2 = vpop.permute.xlu1 %356  ;;  %v354_v29 = vadd.f32 %v352_v19, %v335_v23  ;;  %v355_v30 = vadd.f32 %v353_v20, %v336_v24 }
 0x198   :  { %v359_v18 = vpop.permute.xlu1 %358 }
 0x199   :  { %v361_v21 = vsel %vm360_vm8, %v357_v2, %v359_v18  ;;  %v362_v22 = vsel %vm360_vm8, %v359_v18, %v357_v2  ;;  %v2033_v2 = vstv %s77_s17 }
 0x19a   :  { %v371_v25 = vmul.f32 %v2008_v9, %v361_v21  ;;  %v372_v28 = vmul.f32 %v2011_v10, %v362_v22 }
 0x19c   :  { %v373_v31 = vadd.f32 %v371_v25, %v354_v29  ;;  %v374_v32 = vadd.f32 %v372_v28, %v355_v30 }
 0x1a0   :  { %v2021_v33 = vpop.permute.xlu0 %377 }
 0x1a1   :  { %v2024_v34 = vadd.f32 %v2021_v33, %v373_v31  ;;  %v2027_v35 = vadd.f32 %v2021_v33, %v374_v32 }
 0x1a3   :  { %v382_v38 = vrot.slane %v2024_v34, 4  ;;  %v388_v39 = vrot.slane %v2027_v35, 4 }
 0x1a5   :  { %v383_v40 = vadd.f32 %v382_v38, %v2024_v34  ;;  %v389_v41 = vadd.f32 %v388_v39, %v2027_v35  ;;  %v2083_v38 = vstv %s1556_s0 }
 0x1a7   :  { %v384_v45 = vrot.slane %v383_v40, 2  ;;  %v390_v48 = vrot.slane %v389_v41, 2 }
 0x1a9   :  { %v385_v53 = vadd.f32 %v384_v45, %v383_v40  ;;  %v391_v58 = vadd.f32 %v390_v48, %v389_v41 }
 0x1ab   :  { %v386_v59 = vrot.slane %v385_v53, 1  ;;  %v392_v63 = vrot.slane %v391_v58, 1 }
 0x1ad   :  { %v387_v0 = vadd.f32 %v386_v59, %v385_v53  ;;  %v393_v1 = vadd.f32 %v392_v63, %v391_v58  ;;  %v2091_v59 = vstv %s1555_s19 }
 0x1af   :  { %v395_v44 = vmul.f32 0.125, %v387_v0  ;;  %v396_v3 = vmul.f32 0.125, %v393_v1 }
 0x1b1   :  { %v398_v5 = vmul.f32 %v2033_v2, %v395_v44  ;;  %v399_v11 = vmul.f32 %v2033_v2, %v396_v3 }
 0x1b3   :  { %v401_v12 = vadd.f32 %v2035_v4, %v398_v5  ;;  %v402_v18 = vadd.f32 %v2035_v4, %v399_v11  ;;  %v2099_v5 = vstv %s1557_s20 }
 0x1b5   :  { %v2041_v19 = vmax.f32 %v401_v12, 0.0  ;;  %v2043_v20 = vmax.f32 %v402_v18, 0.0 }
 0x1b7   :  { %420 = vrot.lane.b32.xlu1 %v2043_v20, %s1742_s14  ;;  %418 = vrot.lane.b32.xlu0 %v2041_v19, %s1742_s14 }
 0x1bb   :  { %445 = vrot.lane.b32.xlu1 %v2043_v20, %s1746_s1  ;;  %443 = vrot.lane.b32.xlu0 %v2041_v19, %s1746_s1 }
 0x1bf   :  { %407 = vrot.lane.b32.xlu1 %v2043_v20, %s1745_s28  ;;  %405 = vrot.lane.b32.xlu0 %v2041_v19, %s1745_s28 }
 0x1c3   :  { %470 = vrot.lane.b32.xlu1 %v2043_v20, %s1747_s29  ;;  %468 = vrot.lane.b32.xlu0 %v2041_v19, %s1747_s29 }
 0x1c7   :  { %500 = vrot.lane.b32.xlu1 %v2043_v20, %s1748_s30  ;;  %498 = vrot.lane.b32.xlu0 %v2041_v19, %s1748_s30 }
 0x1cb   :  { %525 = vrot.lane.b32.xlu1 %v2043_v20, %s1749_s8  ;;  %523 = vrot.lane.b32.xlu0 %v2041_v19, %s1749_s8 }
 0x1cf   :  { %550 = vrot.lane.b32.xlu1 %v2043_v20, %s1750_s9  ;;  %548 = vrot.lane.b32.xlu0 %v2041_v19, %s1750_s9 }
 0x1d3   :  { %575 = vrot.lane.b32.xlu1 %v2043_v20, %s1751_s12  ;;  %573 = vrot.lane.b32.xlu0 %v2041_v19, %s1751_s12 }
 0x229   :  { %v421_v21 = vpop.permute.xlu1 %420  ;;  %v419_v22 = vpop.permute.xlu0 %418 }
 0x22a   :  { %v422_v23 = vsel %vm244_vm1, %v419_v22, %v421_v21  ;;  %v423_v24 = vsel %vm244_vm1, %v421_v21, %v419_v22 }
 0x22b   :  { %v426_v25 = vrot.slane %v423_v24, 7  ;;  %v427_v28 = vrot.slane %v422_v23, 7 }
 0x22d   :  { %v430_v29 = vmul.f32 %v426_v25, %v1890_v50  ;;  %v431_v30 = vmul.f32 %v427_v28, %v1899_v52  ;;  %v446_v31 = vpop.permute.xlu1 %445  ;;  %v444_v32 = vpop.permute.xlu0 %443 }
 0x22e   :  { %v447_v39 = vsel %vm263_vm3, %v444_v32, %v446_v31  ;;  %v448_v40 = vsel %vm263_vm3, %v446_v31, %v444_v32 }
 0x22f   :  { %v451_v41 = vrot.slane %v448_v40, 6  ;;  %v452_v45 = vrot.slane %v447_v39, 6  ;;  %v433_v48 = vmul.f32 %v2083_v38, %v430_v29  ;;  %v434_v53 = vmul.f32 %v2083_v38, %v431_v30 }
 0x231   :  { %v408_v58 = vpop.permute.xlu1 %407  ;;  %v406_v63 = vpop.permute.xlu0 %405  ;;  %v455_v0 = vmul.f32 %v451_v41, %v1890_v50  ;;  %v456_v1 = vmul.f32 %v452_v45, %v1899_v52  ;;  %v437_v18 = vrot.slane %v433_v48, 1  ;;  %v438_v21 = vrot.slane %v434_v53, 1 }
 0x232   :  { %v409_v44 = vsel %vm227_vm2, %v406_v63, %v408_v58  ;;  %v410_v3 = vsel %vm227_vm2, %v408_v58, %v406_v63  ;;  %v2113_v45 = vstv %s1558_s21 }
 0x233   :  { %v411_v11 = vmul.f32 %v410_v3, %v1890_v50  ;;  %v412_v12 = vmul.f32 %v409_v44, %v1899_v52  ;;  %v458_v28 = vmul.f32 %v2099_v5, %v455_v0  ;;  %v459_v29 = vmul.f32 %v2099_v5, %v456_v1 }
 0x235   :  { %v414_v22 = vmul.f32 %v2091_v59, %v411_v11  ;;  %v415_v23 = vmul.f32 %v2091_v59, %v412_v12  ;;  %v471_v24 = vpop.permute.xlu1 %470  ;;  %v469_v25 = vpop.permute.xlu0 %468  ;;  %v462_v0 = vrot.slane %v458_v28, 2  ;;  %v463_v1 = vrot.slane %v459_v29, 2 }
 0x236   :  { %v472_v30 = vsel %vm282_vm4, %v469_v25, %v471_v24  ;;  %v473_v31 = vsel %vm282_vm4, %v471_v24, %v469_v25  ;;  %v2128_v24 = vstv %s2103_s22 }
 0x237   :  { %v476_v32 = vrot.slane %v473_v31, 5  ;;  %v477_v39 = vrot.slane %v472_v30, 5  ;;  %v441_v40 = vadd.f32 %v437_v18, %v414_v22  ;;  %v442_v41 = vadd.f32 %v438_v21, %v415_v23  ;;  %2721 = vst [vmem:[#allocation17_spill] sm:$0xff] %v2128_v24 }
 0x239   :  { %v480_v48 = vmul.f32 %v476_v32, %v1890_v50  ;;  %v481_v53 = vmul.f32 %v477_v39, %v1899_v52  ;;  %v501_v58 = vpop.permute.xlu1 %500  ;;  %v499_v63 = vpop.permute.xlu0 %498  ;;  %v466_v22 = vadd.f32 %v462_v0, %v441_v40  ;;  %v467_v23 = vadd.f32 %v463_v1, %v442_v41 }
 0x23a   :  { %v502_v44 = vsel %vm303_vm5, %v499_v63, %v501_v58  ;;  %v503_v3 = vsel %vm303_vm5, %v501_v58, %v499_v63  ;;  %v2132_v39 = vstv %s1559_s23 }
 0x23b   :  { %v483_v11 = vmul.f32 %v2113_v45, %v480_v48  ;;  %v484_v12 = vmul.f32 %v2113_v45, %v481_v53  ;;  %v506_v18 = vrot.slane %v502_v44, 4  ;;  %v507_v21 = vrot.slane %v503_v3, 4  ;;  %2722 = vst [vmem:[#allocation18_spill] sm:$0xff] %v2132_v39 }
 0x23c   :  { %v495_v44 = vmul.f32 %v2132_v39, %v2043_v20  ;;  %v494_v3 = vmul.f32 %v2132_v39, %v2041_v19 }
 0x23d   :  { %v487_v25 = vrot.slane %v483_v11, 3  ;;  %v488_v30 = vrot.slane %v484_v12, 3  ;;  %v510_v28 = vmul.f32 %v506_v18, %v1890_v50  ;;  %v511_v29 = vmul.f32 %v507_v21, %v1899_v52  ;;  %v526_v31 = vpop.permute.xlu1 %525  ;;  %v524_v32 = vpop.permute.xlu0 %523 }
 0x23e   :  { %v527_v48 = vsel %vm322_vm6, %v524_v32, %v526_v31  ;;  %v528_v40 = vsel %vm322_vm6, %v526_v31, %v524_v32  ;;  %v2147_v11 = vstv %s2117_s24  ;;  %v2150_v18 = vstv %s2119_s25 }
 0x23f   :  { %v491_v41 = vadd.f32 %v487_v25, %v466_v22  ;;  %v492_v53 = vadd.f32 %v488_v30, %v467_v23  ;;  %v513_v58 = vmul.f32 %v2128_v24, %v510_v28  ;;  %v514_v63 = vmul.f32 %v2128_v24, %v511_v29  ;;  %2723 = vst [vmem:[#allocation19_spill] sm:$0xff] %v2147_v11 }
 0x240   :  { %v531_v0 = vrot.slane %v527_v48, 3  ;;  %v532_v1 = vrot.slane %v528_v40, 3  ;;  %2724 = vst [vmem:[#allocation20_spill] sm:$0xff] %v2150_v18 }
 0x241   :  { %v551_v12 = vpop.permute.xlu1 %550  ;;  %v549_v21 = vpop.permute.xlu0 %548  ;;  %v497_v20 = vadd.f32 %v495_v44, %v492_v53  ;;  %v496_v28 = vadd.f32 %v494_v3, %v491_v41  ;;  %v517_v31 = vrot.slane %v513_v58, 4  ;;  %v518_v32 = vrot.slane %v514_v63, 4 }
 0x242   :  { %v535_v22 = vmul.f32 %v531_v0, %v1890_v50  ;;  %v536_v23 = vmul.f32 %v532_v1, %v1899_v52  ;;  %v552_v25 = vsel %vm341_vm7, %v549_v21, %v551_v12  ;;  %v553_v30 = vsel %vm341_vm7, %v551_v12, %v549_v21 }
 0x243   :  { %v556_v29 = vrot.slane %v552_v25, 2  ;;  %v557_v19 = vrot.slane %v553_v30, 2  ;;  %v521_v12 = vadd.f32 %v517_v31, %v496_v28  ;;  %v522_v21 = vadd.f32 %v518_v32, %v497_v20 }
 0x244   :  { %v538_v48 = vmul.f32 %v2147_v11, %v535_v22  ;;  %v539_v40 = vmul.f32 %v2147_v11, %v536_v23  ;;  %v2169_v22 = vstv %s2140_s26  ;;  %v2175_v28 = vstv %s1554_s27 }
 0x245   :  { %v560_v0 = vmul.f32 %v556_v29, %v1890_v50  ;;  %v561_v1 = vmul.f32 %v557_v19, %v1899_v52  ;;  %v576_v7 = vpop.permute.xlu1 %575  ;;  %v574_v56 = vpop.permute.xlu0 %573  ;;  %2725 = vst [vmem:[#allocation21_spill] sm:$0xff] %v2169_v22  ;;  %2726 = vst [vmem:[#allocation22_spill] sm:$0xff] %v2175_v28 }
 0x246   :  { %v542_v51 = vrot.slane %v538_v48, 5  ;;  %v543_v47 = vrot.slane %v539_v40, 5  ;;  %v577_v41 = vsel %vm360_vm8, %v574_v56, %v576_v7  ;;  %v578_v53 = vsel %vm360_vm8, %v576_v7, %v574_v56 }
 0x247   :  { %v563_v58 = vmul.f32 %v2150_v18, %v560_v0  ;;  %v564_v63 = vmul.f32 %v2150_v18, %v561_v1  ;;  %v581_v44 = vrot.slane %v577_v41, 1  ;;  %v582_v3 = vrot.slane %v578_v53, 1 }
 0x248   :  { %v546_v19 = vadd.f32 %v542_v51, %v521_v12  ;;  %v547_v48 = vadd.f32 %v543_v47, %v522_v21 }
 0x249   :  { %v567_v23 = vrot.slane %v563_v58, 6  ;;  %v568_v25 = vrot.slane %v564_v63, 6  ;;  %v585_v30 = vmul.f32 %v581_v44, %v1890_v50  ;;  %v586_v29 = vmul.f32 %v582_v3, %v1899_v52 }
 0x24b   :  { %v588_v7 = vmul.f32 %v2169_v22, %v585_v30  ;;  %v589_v56 = vmul.f32 %v2169_v22, %v586_v29  ;;  %v571_v40 = vadd.f32 %v567_v23, %v546_v19  ;;  %v572_v0 = vadd.f32 %v568_v25, %v547_v48  ;;  %v901_v29 = vld [vmem:[#allocation2 + $0x48] sm:$0xff]  ;;  %v903_v19 = vld [vmem:[#allocation2 + $0x58] sm:$0xff] }
 0x24d   :  { %v592_v1 = vrot.slane %v588_v7, 7  ;;  %v593_v41 = vrot.slane %v589_v56, 7 }
 0x24f   :  { %v596_v20 = vadd.f32 %v592_v1, %v571_v40  ;;  %v597_v31 = vadd.f32 %v593_v41, %v572_v0  ;;  %v909_v40 = vpack.c.bf16 %v903_v19, %v901_v29  ;;  %v900_v0 = vld [vmem:[#allocation2 + $0x40] sm:$0xff]  ;;  %v902_v1 = vld [vmem:[#allocation2 + $0x50] sm:$0xff] }
 0x251   :  { %v599_v32 = vadd.f32 %v2175_v28, %v596_v20  ;;  %v600_v53 = vadd.f32 %v2175_v28, %v597_v31  ;;  %v905_v20 = vld [vmem:[#allocation2 + $0x68] sm:$0xff]  ;;  %v907_v31 = vld [vmem:[#allocation2 + $0x78] sm:$0xff] }
 0x253   :  { %v1574_v58 = vmul.f32 -1.442695, %v599_v32  ;;  %v1575_v63 = vmul.f32 -1.442695, %v600_v53  ;;  %v911_v32 = vpack.c.bf16 %v907_v31, %v905_v20  ;;  %v904_v53 = vld [vmem:[#allocation2 + $0x60] sm:$0xff] }
 0x255   :  { %1628 = vpow2.f32 %v1574_v58  ;;  %v906_v58 = vld [vmem:[#allocation2 + $0x70] sm:$0xff] }
 0x256   :  { %1630 = vpow2.f32 %v1575_v63  ;;  %v2728_v63 = vmov 0  }
 0x25f   :  { %v1629_v47 = vpop.eup %1628 }
 0x260   :  { %v1631_v51 = vpop.eup %1630  ;;  %v607_v44 = vadd.f32 1.0, %v1629_v47  ;;  %v910_v47 = vpack.c.bf16 %v906_v58, %v904_v53 }
 0x261   :  { %v608_v3 = vadd.f32 1.0, %v1631_v51  ;;  %v2196_v51 = vld [vmem:[%s2680_s5 + $0x8] sm:$0xff]  }
 0x262   :  { %1632 = vrcp.f32 %v607_v44  ;;  %2729 = vst [vmem:[#allocation24_spill] sm:$0xff] %v2196_v51  ;;  %v2204_v44 = vld [vmem:[%s2680_s5 + $0x10] sm:$0xff]  }
 0x263   :  { %1634 = vrcp.f32 %v608_v3  ;;  %2730 = vst [vmem:[#allocation25_spill] sm:$0xff] %v2204_v44  ;;  %v2212_v3 = vld [vmem:[%s2680_s5 + $0x18] sm:$0xff]  }
 0x264   :  { %2731 = vst [vmem:[#allocation26_spill] sm:$0xff] %v2212_v3 }
 0x26c   :  { %v1633_v12 = vpop.eup %1632 }
 0x26d   :  { %v1635_v21 = vpop.eup %1634  ;;  %v616_v23 = vrot.slane %v1633_v12, %v1885_v49  ;;  %v2220_v12 = vld [vmem:[%s2680_s5 + $0x20] ss:$0 sps:$4 sm:$0xff]  }
 0x26e   :  { %v620_v25 = vrot.slane %v1635_v21, %v1885_v49  ;;  %2732 = vst [vmem:[#allocation27_spill] sm:$0xff] %v2220_v12 }
 0x26f   :  { %v621_v30 = vadd.f32 %v616_v23, %v2024_v34  ;;  %v2188_v34 = vld [vmem:[%s2680_s5] sm:$0xff]  }
 0x270   :  { %v622_v48 = vadd.f32 %v620_v25, %v2027_v35  ;;  %2727 = vst [vmem:[#allocation23_spill] sm:$0xff] %v2188_v34  ;;  %v908_v35 = vpack.c.bf16 %v902_v1, %v900_v0 }
 0x271   :  { %v623_v7 = vpack.c.bf16 %v621_v30, %v621_v30 }
 0x272   :  { %v624_v56 = vpack.c.bf16 %v622_v48, %v622_v48 }
 0x273   :  { %v666_v41 = vsel %vm664_vm9, %v623_v7, 0 }
 0x274   :  { %1581 = vmatprep.subr.msk.bf16.mxu1 %vm664_vm9, %v624_v56 }
 0x275   :  { %672 = vmatpush1.bf16.msra.mxu1 %v666_v41 }
 0x276   :  { %912 = vmatprep.subr.bf16.mxu1 %v909_v40 }
 0x278   :  { %1582 = vmatmul.mubr.msk.bf16.vlgmr.msra.gmra.mrb[0].mxu1 %vm648_vm10, %v2188_v34 }
 0x279   :  { %713 = vmatprep.mubr.bf16.mxu1 %v2728_v63  ;;  %913 = vmatpush1.bf16.msra.mxu1 %v908_v35 }
 0x27a   :  { %914 = vmatprep.subr.bf16.mxu1 %v911_v32 }
 0x27d   :  { %915 = vmatpush1.bf16.msra.mxu1 %v910_v47 }
 0x280   :  { %1583 = vmatmul.mubr.msk.bf16.gmra.mrb[4].mxu1 %vm648_vm10, %v2196_v51 }
 0x281   :  { %723 = vmatprep.mubr.bf16.mxu1 %v2728_v63 }
 0x288   :  { %1584 = vmatmul.mubr.msk.bf16.gmra.mrb[8].mxu1 %vm648_vm10, %v2204_v44 }
 0x289   :  { %733 = vmatprep.mubr.bf16.mxu1 %v2728_v63 }
 0x290   :  { %1585 = vmatmul.mubr.msk.bf16.gmra.mrb[12].mxu1 %vm648_vm10, %v2212_v3 }
 0x291   :  { %743 = vmatprep.mubr.bf16.mxu1 %v2728_v63 }
 0x298   :  { %1586 = vmatmul.mubr.msk.bf16.gmra.mrb[16].mxu1 %vm648_vm10, %v2220_v12 }
 0x299   :  { %944 = vmatprep.mubr.bf16.mxu1 %v2728_v63 }
 0x2a0   :  { %1589 = vmatmul.mubr.msk.bf16.vlgmr.msra.gmra.mrb[20].mxu1 %vm124_vm0, %v1817_v13 }
 0x2a1   :  { %954 = vmatprep.mubr.bf16.mxu1 %v2728_v63 }
 0x2a8   :  { %1590 = vmatmul.mubr.msk.bf16.gmra.mrb[24].mxu1 %vm124_vm0, %v1825_v14 }
 0x2a9   :  { %964 = vmatprep.mubr.bf16.mxu1 %v2728_v63 }
 0x2b0   :  { %1591 = vmatmul.mubr.msk.bf16.gmra.mrb[28].mxu1 %vm124_vm0, %v1833_v15 }
 0x2b1   :  { %974 = vmatprep.mubr.bf16.mxu1 %v2728_v63 }
 0x2b8   :  { %1592 = vmatmul.mubr.msk.bf16.gmra.mrb[32].mxu1 %vm124_vm0, %v1841_v16 }
 0x2b9   :  { %984 = vmatprep.mubr.bf16.mxu1 %v2728_v63 }
 0x2c0   :  { %1593 = vmatmul.mubr.msk.bf16.gmra.mrb[36].mxu1 %vm124_vm0, %v1849_v17 }
 0x34b   :  { %v2239_v13 = vpop.f32.mrb[0].mxu1 }
 0x34c   :  { %v2241_v21 = vpop.f32.mrb[1].mxu1 }
 0x34d   :  { %v2243_v14 = vpop.f32.mrb[2].mxu1 }
 0x34e   :  { %v2245_v23 = vpop.f32.mrb[3].mxu1 }
 0x353   :  { %v2247_v25 = vpop.f32.mrb[4].mxu1 }
 0x354   :  { %v2249_v15 = vpop.f32.mrb[5].mxu1 }
 0x355   :  { %v2251_v30 = vpop.f32.mrb[6].mxu1 }
 0x356   :  { %v2253_v16 = vpop.f32.mrb[7].mxu1 }
 0x35b   :  { %v2255_v29 = vpop.f32.mrb[8].mxu1 }
 0x35c   :  { %2733 = vst [vmem:[#allocation28_spill] sm:$0xff] %v2255_v29  ;;  %v2257_v19 = vpop.f32.mrb[9].mxu1 }
 0x35d   :  { %2734 = vst [vmem:[#allocation29_spill] sm:$0xff] %v2257_v19  ;;  %v2259_v17 = vpop.f32.mrb[10].mxu1 }
 0x35e   :  { %v2261_v48 = vpop.f32.mrb[11].mxu1 }
 0x363   :  { %v2263_v7 = vpop.f32.mrb[12].mxu1 }
 0x364   :  { %v2265_v56 = vpop.f32.mrb[13].mxu1 }
 0x365   :  { %v2267_v40 = vpop.f32.mrb[14].mxu1 }
 0x366   :  { %v2269_v0 = vpop.f32.mrb[15].mxu1 }
 0x36b   :  { %v2271_v1 = vpop.f32.mrb[16].mxu1 }
 0x36c   :  { %v2273_v41 = vpop.f32.mrb[17].mxu1 }
 0x36d   :  { %v749_v20 = vpop.f32.mrb[18].mxu1 }
 0x36e   :  { %v750_v31 = vpop.f32.mrb[19].mxu1 }
 0x373   :  { %v946_v35 = vpop.f32.mrb[20].mxu1 }
 0x374   :  { %993 = vrot.lane.b32.xlu0 %v946_v35, %s1745_s28  ;;  %v948_v32 = vpop.f32.mrb[21].mxu1 }
 0x375   :  { %995 = vrot.lane.b32.xlu1 %v948_v32, %s1745_s28  ;;  %v950_v53 = vpop.f32.mrb[22].mxu1 }
 0x376   :  { %v952_v58 = vpop.f32.mrb[23].mxu1 }
 0x378   :  { %1001 = vrot.lane.b32.xlu0 %v950_v53, %s1742_s14 }
 0x379   :  { %1003 = vrot.lane.b32.xlu1 %v952_v58, %s1742_s14 }
 0x37b   :  { %v956_v47 = vpop.f32.mrb[24].mxu1 }
 0x37c   :  { %1011 = vrot.lane.b32.xlu0 %v956_v47, %s1746_s1  ;;  %v958_v12 = vpop.f32.mrb[25].mxu1 }
 0x37d   :  { %1013 = vrot.lane.b32.xlu1 %v958_v12, %s1746_s1  ;;  %v960_v20 = vpop.f32.mrb[26].mxu1 }
 0x37e   :  { %v962_v31 = vpop.f32.mrb[27].mxu1 }
 0x380   :  { %1021 = vrot.lane.b32.xlu0 %v960_v20, %s1747_s29 }
 0x381   :  { %1023 = vrot.lane.b32.xlu1 %v962_v31, %s1747_s29 }
 0x383   :  { %v966_v35 = vpop.f32.mrb[28].mxu1 }
 0x384   :  { %v968_v32 = vpop.f32.mrb[29].mxu1 }
 0x385   :  { %v970_v3 = vpop.f32.mrb[30].mxu1 }
 0x386   :  { %1033 = vrot.lane.b32.xlu0 %v970_v3, %s1748_s30  ;;  %v972_v53 = vpop.f32.mrb[31].mxu1 }
 0x387   :  { %1035 = vrot.lane.b32.xlu1 %v972_v53, %s1748_s30 }
 0x38b   :  { %v976_v58 = vpop.f32.mrb[32].mxu1 }
 0x38c   :  { %1043 = vrot.lane.b32.xlu0 %v976_v58, %s1749_s8  ;;  %v978_v47 = vpop.f32.mrb[33].mxu1 }
 0x38d   :  { %1045 = vrot.lane.b32.xlu1 %v978_v47, %s1749_s8  ;;  %v980_v12 = vpop.f32.mrb[34].mxu1 }
 0x38e   :  { %v982_v44 = vpop.f32.mrb[35].mxu1 }
 0x390   :  { %1053 = vrot.lane.b32.xlu0 %v980_v12, %s1750_s9 }
 0x391   :  { %1055 = vrot.lane.b32.xlu1 %v982_v44, %s1750_s9 }
 0x393   :  { %v986_v20 = vpop.f32.mrb[36].mxu1 }
 0x394   :  { %1063 = vrot.lane.b32.xlu0 %v986_v20, %s1751_s12  ;;  %v988_v31 = vpop.f32.mrb[37].mxu1 }
 0x395   :  { %1065 = vrot.lane.b32.xlu1 %v988_v31, %s1751_s12  ;;  %v990_v3 = vpop.f32.mrb[38].mxu1 }
 0x396   :  { %v991_v53 = vpop.f32.mrb[39].mxu1 }
 0x3e6   :  { %v994_v51 = vpop.permute.xlu0 %993 }
 0x3e7   :  { %v996_v63 = vpop.permute.xlu1 %995 }
 0x3e8   :  { %v997_v20 = vsel %vm227_vm2, %v994_v51, %v996_v63  ;;  %v998_v31 = vsel %vm227_vm2, %v996_v63, %v994_v51 }
 0x3e9   :  { %v999_v18 = vmul.f32 %v998_v31, %v1916_v57  ;;  %v1000_v63 = vmul.f32 %v997_v20, %v1924_v60 }
 0x3ea   :  { %v1002_v58 = vpop.permute.xlu0 %1001 }
 0x3eb   :  { %v1004_v34 = vpop.permute.xlu1 %1003 }
 0x3ec   :  { %v1005_v29 = vsel %vm244_vm1, %v1002_v58, %v1004_v34  ;;  %v1006_v44 = vsel %vm244_vm1, %v1004_v34, %v1002_v58 }
 0x3ed   :  { %v1007_v28 = vmul.f32 %v1006_v44, %v1904_v54  ;;  %v1008_v22 = vmul.f32 %v1005_v29, %v1908_v55 }
 0x3ee   :  { %v1012_v19 = vpop.permute.xlu0 %1011 }
 0x3ef   :  { %v1014_v47 = vpop.permute.xlu1 %1013 }
 0x3f0   :  { %v1015_v3 = vsel %vm263_vm3, %v1012_v19, %v1014_v47  ;;  %v1016_v53 = vsel %vm263_vm3, %v1014_v47, %v1012_v19  ;;  %v1009_v19 = vadd.f32 %v1007_v28, %v999_v18  ;;  %v1010_v47 = vadd.f32 %v1008_v22, %v1000_v63 }
 0x3f1   :  { %v1017_v51 = vmul.f32 %v1016_v53, %v1928_v61  ;;  %v1018_v11 = vmul.f32 %v1015_v3, %v1932_v62 }
 0x3f2   :  { %v1022_v12 = vpop.permute.xlu0 %1021 }
 0x3f3   :  { %v1024_v49 = vpop.permute.xlu1 %1023  ;;  %v1019_v54 = vadd.f32 %v1017_v51, %v1009_v19  ;;  %v1020_v24 = vadd.f32 %v1018_v11, %v1010_v47 }
 0x3f4   :  { %v1025_v34 = vsel %vm282_vm4, %v1022_v12, %v1024_v49  ;;  %v1026_v58 = vsel %vm282_vm4, %v1024_v49, %v1022_v12 }
 0x3f5   :  { %v1027_v44 = vmul.f32 %v1026_v58, %v1947_v6  ;;  %v1028_v29 = vmul.f32 %v1025_v34, %v1951_v8 }
 0x3f7   :  { %v1029_v31 = vadd.f32 %v1027_v44, %v1019_v54  ;;  %v1030_v53 = vadd.f32 %v1028_v29, %v1020_v24 }
 0x3f8   :  { %v1034_v39 = vpop.permute.xlu0 %1033 }
 0x3f9   :  { %v1036_v55 = vpop.permute.xlu1 %1035  ;;  %v1031_v58 = vadd.f32 %v1029_v31, %v966_v35  ;;  %v1032_v63 = vadd.f32 %v1030_v53, %v968_v32 }
 0x3fa   :  { %v1037_v49 = vsel %vm303_vm5, %v1034_v39, %v1036_v55  ;;  %v1038_v12 = vsel %vm303_vm5, %v1036_v55, %v1034_v39 }
 0x3fb   :  { %v1039_v28 = vmul.f32 %v1037_v49, %v1967_v36  ;;  %v1040_v11 = vmul.f32 %v1038_v12, %v1970_v37 }
 0x3fd   :  { %v1041_v19 = vadd.f32 %v1039_v28, %v1031_v58  ;;  %v1042_v47 = vadd.f32 %v1040_v11, %v1032_v63 }
 0x3fe   :  { %v1044_v20 = vpop.permute.xlu0 %1043 }
 0x3ff   :  { %v1046_v3 = vpop.permute.xlu1 %1045 }
 0x400   :  { %v1047_v18 = vsel %vm322_vm6, %v1044_v20, %v1046_v3  ;;  %v1048_v22 = vsel %vm322_vm6, %v1046_v3, %v1044_v20 }
 0x401   :  { %v1049_v51 = vmul.f32 %v1047_v18, %v1979_v42  ;;  %v1050_v55 = vmul.f32 %v1048_v22, %v1982_v43 }
 0x402   :  { %v1054_v34 = vpop.permute.xlu0 %1053 }
 0x403   :  { %v1056_v54 = vpop.permute.xlu1 %1055  ;;  %v1051_v35 = vadd.f32 %v1049_v51, %v1041_v19  ;;  %v1052_v32 = vadd.f32 %v1050_v55, %v1042_v47 }
 0x404   :  { %v1057_v24 = vsel %vm341_vm7, %v1054_v34, %v1056_v54  ;;  %v1058_v39 = vsel %vm341_vm7, %v1056_v54, %v1054_v34 }
 0x405   :  { %v1059_v44 = vmul.f32 %v1057_v24, %v1995_v26  ;;  %v1060_v29 = vmul.f32 %v1058_v39, %v1998_v27 }
 0x406   :  { %v1064_v49 = vpop.permute.xlu0 %1063 }
 0x407   :  { %v1066_v12 = vpop.permute.xlu1 %1065  ;;  %v1061_v53 = vadd.f32 %v1059_v44, %v1051_v35  ;;  %v1062_v3 = vadd.f32 %v1060_v29, %v1052_v32 }
 0x408   :  { %v1067_v20 = vsel %vm360_vm8, %v1064_v49, %v1066_v12  ;;  %v1068_v31 = vsel %vm360_vm8, %v1066_v12, %v1064_v49 }
 0x409   :  { %v1069_v18 = vmul.f32 %v1067_v20, %v2008_v9  ;;  %v1070_v22 = vmul.f32 %v1068_v31, %v2011_v10 }
 0x40b   :  { %v1071_v28 = vadd.f32 %v1069_v18, %v1061_v53  ;;  %v1072_v11 = vadd.f32 %v1070_v22, %v1062_v3 }
 0x40d   :  { %v2340_v34 = vadd.f32 %v1071_v28, %v2021_v33  ;;  %v2343_v58 = vadd.f32 %v1072_v11, %v2021_v33  ;;  %v2445_v28 = vld [vmem:[%s2679_s4 + $0x8] sm:$0xff] }
 0x40f   :  { %v1075_v63 = vrot.slane %v2340_v34, 4  ;;  %v1081_v51 = vrot.slane %v2343_v58, 4 }
 0x411   :  { %v1076_v55 = vadd.f32 %v1075_v63, %v2340_v34  ;;  %v1082_v54 = vadd.f32 %v1081_v51, %v2343_v58 }
 0x413   :  { %v1077_v24 = vrot.slane %v1076_v55, 2  ;;  %v1083_v39 = vrot.slane %v1082_v54, 2 }
 0x415   :  { %v1078_v19 = vadd.f32 %v1077_v24, %v1076_v55  ;;  %v1084_v47 = vadd.f32 %v1083_v39, %v1082_v54 }
 0x417   :  { %v1079_v44 = vrot.slane %v1078_v19, 1  ;;  %v1085_v29 = vrot.slane %v1084_v47, 1 }
 0x419   :  { %v1080_v49 = vadd.f32 %v1079_v44, %v1078_v19  ;;  %v1086_v35 = vadd.f32 %v1085_v29, %v1084_v47 }
 0x41b   :  { %v1087_v32 = vmul.f32 0.125, %v1080_v49  ;;  %v1088_v12 = vmul.f32 0.125, %v1086_v35 }
 0x41d   :  { %v1089_v33 = vmul.f32 %v1087_v32, %v2033_v2  ;;  %v1090_v20 = vmul.f32 %v1088_v12, %v2033_v2  ;;  %v74_v2 = vld [vmem:[%s2681_s6] sm:$0xff] }
 0x41f   :  { %v1091_v31 = vadd.f32 %v1089_v33, %v2035_v4  ;;  %v1092_v53 = vadd.f32 %v1090_v20, %v2035_v4 }
 0x421   :  { %v2353_v3 = vmax.f32 %v1091_v31, 0.0  ;;  %v2355_v18 = vmax.f32 %v1092_v53, 0.0 }
 0x423   :  { %1109 = vrot.lane.b32.xlu1 %v2355_v18, %s1742_s14  ;;  %1107 = vrot.lane.b32.xlu0 %v2353_v3, %s1742_s14 }
 0x427   :  { %1133 = vrot.lane.b32.xlu1 %v2355_v18, %s1746_s1  ;;  %1131 = vrot.lane.b32.xlu0 %v2353_v3, %s1746_s1 }
 0x42b   :  { %1097 = vrot.lane.b32.xlu1 %v2355_v18, %s1745_s28  ;;  %1095 = vrot.lane.b32.xlu0 %v2353_v3, %s1745_s28 }
 0x42f   :  { %1157 = vrot.lane.b32.xlu1 %v2355_v18, %s1747_s29  ;;  %1155 = vrot.lane.b32.xlu0 %v2353_v3, %s1747_s29 }
 0x433   :  { %1185 = vrot.lane.b32.xlu1 %v2355_v18, %s1748_s30  ;;  %1183 = vrot.lane.b32.xlu0 %v2353_v3, %s1748_s30 }
 0x437   :  { %1209 = vrot.lane.b32.xlu1 %v2355_v18, %s1749_s8  ;;  %1207 = vrot.lane.b32.xlu0 %v2353_v3, %s1749_s8 }
 0x43b   :  { %1233 = vrot.lane.b32.xlu1 %v2355_v18, %s1750_s9  ;;  %1231 = vrot.lane.b32.xlu0 %v2353_v3, %s1750_s9 }
 0x43f   :  { %1257 = vrot.lane.b32.xlu1 %v2355_v18, %s1751_s12  ;;  %1255 = vrot.lane.b32.xlu0 %v2353_v3, %s1751_s12 }
 0x443   :  { %754 = vrot.lane.b32.xlu1 %v2241_v21, %s1745_s28  ;;  %752 = vrot.lane.b32.xlu0 %v2239_v13, %s1745_s28 }
 0x447   :  { %762 = vrot.lane.b32.xlu1 %v2245_v23, %s1742_s14  ;;  %760 = vrot.lane.b32.xlu0 %v2243_v14, %s1742_s14 }
 0x44b   :  { %772 = vrot.lane.b32.xlu1 %v2249_v15, %s1746_s1  ;;  %770 = vrot.lane.b32.xlu0 %v2247_v25, %s1746_s1 }
 0x44f   :  { %782 = vrot.lane.b32.xlu1 %v2253_v16, %s1747_s29  ;;  %780 = vrot.lane.b32.xlu0 %v2251_v30, %s1747_s29 }
 0x453   :  { %794 = vrot.lane.b32.xlu1 %v2261_v48, %s1748_s30  ;;  %792 = vrot.lane.b32.xlu0 %v2259_v17, %s1748_s30 }
 0x457   :  { %804 = vrot.lane.b32.xlu1 %v2265_v56, %s1749_s8  ;;  %802 = vrot.lane.b32.xlu0 %v2263_v7, %s1749_s8 }
 0x45b   :  { %814 = vrot.lane.b32.xlu1 %v2269_v0, %s1750_s9  ;;  %812 = vrot.lane.b32.xlu0 %v2267_v40, %s1750_s9 }
 0x45f   :  { %822 = vrot.lane.b32.xlu1 %v2271_v1, %s1751_s12  ;;  %834 = vperm.xlu0 %1617, %v74_v2  }
 0x463   :  { %824 = vrot.lane.b32.xlu0 %v2273_v41, %s1751_s12 }
 0x495   :  { %v1110_v4 = vpop.permute.xlu1 %1109  ;;  %v1108_v13 = vpop.permute.xlu0 %1107 }
 0x496   :  { %v1111_v21 = vsel %vm244_vm1, %v1108_v13, %v1110_v4  ;;  %v1112_v14 = vsel %vm244_vm1, %v1110_v4, %v1108_v13 }
 0x497   :  { %v1115_v23 = vrot.slane %v1112_v14, 7  ;;  %v1116_v25 = vrot.slane %v1111_v21, 7 }
 0x499   :  { %v1119_v15 = vmul.f32 %v1115_v23, %v1890_v50  ;;  %v1120_v30 = vmul.f32 %v1116_v25, %v1899_v52  ;;  %v1134_v16 = vpop.permute.xlu1 %1133  ;;  %v1132_v17 = vpop.permute.xlu0 %1131  ;;  %v2439_v50 = vld [vmem:[%s2679_s4] sm:$0xff]  ;;  %s1752_s4 = smov [#allocation7]  }
 0x49a   :  { %v1135_v48 = vsel %vm263_vm3, %v1132_v17, %v1134_v16  ;;  %v1136_v7 = vsel %vm263_vm3, %v1134_v16, %v1132_v17 }
 0x49b   :  { %v1139_v56 = vrot.slane %v1136_v7, 6  ;;  %v1140_v40 = vrot.slane %v1135_v48, 6  ;;  %v1121_v0 = vmul.f32 %v1119_v15, %v2083_v38  ;;  %v1122_v1 = vmul.f32 %v1120_v30, %v2083_v38 }
 0x49d   :  { %v1098_v41 = vpop.permute.xlu1 %1097  ;;  %v1096_v22 = vpop.permute.xlu0 %1095  ;;  %v1143_v52 = vmul.f32 %v2439_v50, %v1139_v56  ;;  %v1144_v11 = vmul.f32 %v2445_v28, %v1140_v40  ;;  %v1125_v54 = vrot.slane %v1121_v0, 1  ;;  %v1126_v24 = vrot.slane %v1122_v1, 1 }
 0x49e   :  { %v1099_v63 = vsel %vm227_vm2, %v1096_v22, %v1098_v41  ;;  %v1100_v38 = vsel %vm227_vm2, %v1098_v41, %v1096_v22 }
 0x49f   :  { %v1101_v51 = vmul.f32 %v2439_v50, %v1100_v38  ;;  %v1102_v55 = vmul.f32 %v2445_v28, %v1099_v63  ;;  %v1145_v29 = vmul.f32 %v1143_v52, %v2099_v5  ;;  %v1146_v49 = vmul.f32 %v1144_v11, %v2099_v5  ;;  %v2735_v11 = vld [vmem:[#allocation17_spill] sm:$0xff] }
 0x4a1   :  { %v1103_v39 = vmul.f32 %v1101_v51, %v2091_v59  ;;  %v1104_v19 = vmul.f32 %v1102_v55, %v2091_v59  ;;  %v1158_v47 = vpop.permute.xlu1 %1157  ;;  %v1156_v44 = vpop.permute.xlu0 %1155  ;;  %v1149_v13 = vrot.slane %v1145_v29, 2  ;;  %v1150_v21 = vrot.slane %v1146_v49, 2 }
 0x4a2   :  { %v1159_v35 = vsel %vm282_vm4, %v1156_v44, %v1158_v47  ;;  %v1160_v32 = vsel %vm282_vm4, %v1158_v47, %v1156_v44 }
 0x4a3   :  { %v1163_v12 = vrot.slane %v1160_v32, 5  ;;  %v1164_v33 = vrot.slane %v1159_v35, 5  ;;  %v1129_v20 = vadd.f32 %v1125_v54, %v1103_v39  ;;  %v1130_v31 = vadd.f32 %v1126_v24, %v1104_v19  ;;  %v2736_v54 = vld [vmem:[#allocation18_spill] sm:$0xff] }
 0x4a4   :  { %v1180_v24 = vmul.f32 %v2355_v18, %v2736_v54  ;;  %v1179_v39 = vmul.f32 %v2353_v3, %v2736_v54 }
 0x4a5   :  { %v1167_v53 = vmul.f32 %v2439_v50, %v1163_v12  ;;  %v1168_v59 = vmul.f32 %v2445_v28, %v1164_v33  ;;  %v1186_v2 = vpop.permute.xlu1 %1185  ;;  %v1184_v4 = vpop.permute.xlu0 %1183  ;;  %v1153_v16 = vadd.f32 %v1149_v13, %v1129_v20  ;;  %v1154_v17 = vadd.f32 %v1150_v21, %v1130_v31 }
 0x4a6   :  { %v1187_v5 = vsel %vm303_vm5, %v1184_v4, %v1186_v2  ;;  %v1188_v14 = vsel %vm303_vm5, %v1186_v2, %v1184_v4 }
 0x4a7   :  { %v1169_v23 = vmul.f32 %v1167_v53, %v2113_v45  ;;  %v1170_v25 = vmul.f32 %v1168_v59, %v2113_v45  ;;  %v1191_v15 = vrot.slane %v1187_v5, 4  ;;  %v1192_v30 = vrot.slane %v1188_v14, 4  ;;  %v2737_v53 = vld [vmem:[#allocation19_spill] sm:$0xff] }
 0x4a9   :  { %v1173_v48 = vrot.slane %v1169_v23, 3  ;;  %v1174_v7 = vrot.slane %v1170_v25, 3  ;;  %v1195_v56 = vmul.f32 %v2439_v50, %v1191_v15  ;;  %v1196_v40 = vmul.f32 %v2445_v28, %v1192_v30  ;;  %v1210_v0 = vpop.permute.xlu1 %1209  ;;  %v1208_v1 = vpop.permute.xlu0 %1207  ;;  %v2738_v15 = vld [vmem:[#allocation20_spill] sm:$0xff] }
 0x4aa   :  { %v1211_v41 = vsel %vm322_vm6, %v1208_v1, %v1210_v0  ;;  %v1212_v22 = vsel %vm322_vm6, %v1210_v0, %v1208_v1 }
 0x4ab   :  { %v1177_v52 = vadd.f32 %v1173_v48, %v1153_v16  ;;  %v1178_v45 = vadd.f32 %v1174_v7, %v1154_v17  ;;  %v1197_v63 = vmul.f32 %v1195_v56, %v2735_v11  ;;  %v1198_v38 = vmul.f32 %v1196_v40, %v2735_v11 }
 0x4ac   :  { %v1215_v51 = vrot.slane %v1211_v41, 3  ;;  %v1216_v55 = vrot.slane %v1212_v22, 3 }
 0x4ad   :  { %v1234_v19 = vpop.permute.xlu1 %1233  ;;  %v1232_v47 = vpop.permute.xlu0 %1231  ;;  %v1182_v32 = vadd.f32 %v1180_v24, %v1178_v45  ;;  %v1181_v12 = vadd.f32 %v1179_v39, %v1177_v52  ;;  %v1201_v18 = vrot.slane %v1197_v63, 4  ;;  %v1202_v31 = vrot.slane %v1198_v38, 4  ;;  %v2739_v63 = vld [vmem:[#allocation21_spill] sm:$0xff] }
 0x4ae   :  { %v1219_v44 = vmul.f32 %v2439_v50, %v1215_v51  ;;  %v1220_v29 = vmul.f32 %v2445_v28, %v1216_v55  ;;  %v1235_v49 = vsel %vm341_vm7, %v1232_v47, %v1234_v19  ;;  %v1236_v35 = vsel %vm341_vm7, %v1234_v19, %v1232_v47 }
 0x4af   :  { %v1239_v33 = vrot.slane %v1235_v49, 2  ;;  %v1240_v20 = vrot.slane %v1236_v35, 2  ;;  %v1205_v7 = vadd.f32 %v1201_v18, %v1181_v12  ;;  %v1206_v56 = vadd.f32 %v1202_v31, %v1182_v32  ;;  %v2740_v49 = vld [vmem:[#allocation22_spill] sm:$0xff] }
 0x4b0   :  { %v1221_v3 = vmul.f32 %v1219_v44, %v2737_v53  ;;  %v1222_v59 = vmul.f32 %v1220_v29, %v2737_v53 }
 0x4b1   :  { %v1243_v2 = vmul.f32 %v2439_v50, %v1239_v33  ;;  %v1244_v4 = vmul.f32 %v2445_v28, %v1240_v20  ;;  %v1258_v13 = vpop.permute.xlu1 %1257  ;;  %v1256_v21 = vpop.permute.xlu0 %1255 }
 0x4b2   :  { %v1225_v5 = vrot.slane %v1221_v3, 5  ;;  %v1226_v14 = vrot.slane %v1222_v59, 5  ;;  %v1259_v23 = vsel %vm360_vm8, %v1256_v21, %v1258_v13  ;;  %v1260_v25 = vsel %vm360_vm8, %v1258_v13, %v1256_v21 }
 0x4b3   :  { %v1245_v30 = vmul.f32 %v1243_v2, %v2738_v15  ;;  %v1246_v16 = vmul.f32 %v1244_v4, %v2738_v15  ;;  %v1263_v17 = vrot.slane %v1259_v23, 1  ;;  %v1264_v48 = vrot.slane %v1260_v25, 1  ;;  %v2741_v25 = vld [vmem:[#allocation14_spill] sm:$0xff] }
 0x4b4   :  { %v1229_v45 = vadd.f32 %v1225_v5, %v1205_v7  ;;  %v1230_v11 = vadd.f32 %v1226_v14, %v1206_v56 }
 0x4b5   :  { %v1249_v40 = vrot.slane %v1245_v30, 6  ;;  %v1250_v0 = vrot.slane %v1246_v16, 6  ;;  %v1267_v1 = vmul.f32 %v2439_v50, %v1263_v17  ;;  %v1268_v41 = vmul.f32 %v2445_v28, %v1264_v48  ;;  %v755_v22 = vpop.permute.xlu1 %754  ;;  %v753_v52 = vpop.permute.xlu0 %752  ;;  %v2742_v16 = vld [vmem:[#allocation15_spill] sm:$0xff] }
 0x4b6   :  { %v757_v13 = vsel %vm227_vm2, %v755_v22, %v753_v52  ;;  %v756_v23 = vsel %vm227_vm2, %v753_v52, %v755_v22 }
 0x4b7   :  { %v1269_v38 = vmul.f32 %v1267_v1, %v2739_v63  ;;  %v1270_v51 = vmul.f32 %v1268_v41, %v2739_v63  ;;  %v1253_v55 = vadd.f32 %v1249_v40, %v1229_v45  ;;  %v1254_v54 = vadd.f32 %v1250_v0, %v1230_v11 }
 0x4b8   :  { %v758_v7 = vmul.f32 %v757_v13, %v1916_v57  ;;  %v759_v0 = vmul.f32 %v756_v23, %v1924_v60 }
 0x4b9   :  { %v1273_v24 = vrot.slane %v1269_v38, 7  ;;  %v1274_v39 = vrot.slane %v1270_v51, 7  ;;  %v763_v44 = vpop.permute.xlu1 %762  ;;  %v761_v29 = vpop.permute.xlu0 %760 }
 0x4ba   :  { %v765_v59 = vsel %vm244_vm1, %v763_v44, %v761_v29  ;;  %v764_v4 = vsel %vm244_vm1, %v761_v29, %v763_v44  ;;  %v2743_v44 = vld [vmem:[#allocation12_spill] sm:$0xff] }
 0x4bb   :  { %v1277_v19 = vadd.f32 %v1273_v24, %v1253_v55  ;;  %v1278_v47 = vadd.f32 %v1274_v39, %v1254_v54  ;;  %v766_v15 = vmul.f32 %v765_v59, %v2741_v25  ;;  %v767_v17 = vmul.f32 %v764_v4, %v2742_v16 }
 0x4bd   :  { %v1279_v50 = vadd.f32 %v1277_v19, %v2740_v49  ;;  %v1280_v28 = vadd.f32 %v1278_v47, %v2740_v49  ;;  %v773_v12 = vpop.permute.xlu1 %772  ;;  %v771_v33 = vpop.permute.xlu0 %770  ;;  %v768_v41 = vadd.f32 %v766_v15, %v758_v7  ;;  %v769_v52 = vadd.f32 %v767_v17, %v759_v0 }
 0x4be   :  { %v775_v21 = vsel %vm263_vm3, %v773_v12, %v771_v33  ;;  %v774_v30 = vsel %vm263_vm3, %v771_v33, %v773_v12 }
 0x4bf   :  { %v1594_v35 = vmul.f32 -1.442695, %v1279_v50  ;;  %v1595_v32 = vmul.f32 -1.442695, %v1280_v28  ;;  %v776_v56 = vmul.f32 %v775_v21, %v1928_v61  ;;  %v777_v1 = vmul.f32 %v774_v30, %v1932_v62 }
 0x4c1   :  { %1636 = vpow2.f32 %v1594_v35  ;;  %v783_v20 = vpop.permute.xlu1 %782  ;;  %v781_v18 = vpop.permute.xlu0 %780  ;;  %v778_v38 = vadd.f32 %v776_v56, %v768_v41  ;;  %v779_v51 = vadd.f32 %v777_v1, %v769_v52  ;;  %v2744_v35 = vld [vmem:[#allocation28_spill] sm:$0xff] }
 0x4c2   :  { %1638 = vpow2.f32 %v1595_v32  ;;  %v785_v48 = vsel %vm282_vm4, %v783_v20, %v781_v18  ;;  %v784_v40 = vsel %vm282_vm4, %v781_v18, %v783_v20  ;;  %v2745_v18 = vld [vmem:[#allocation29_spill] sm:$0xff] }
 0x4c3   :  { %v786_v22 = vmul.f32 %v785_v48, %v1947_v6  ;;  %v787_v45 = vmul.f32 %v784_v40, %v1951_v8 }
 0x4c5   :  { %v795_v5 = vpop.permute.xlu1 %794  ;;  %v793_v14 = vpop.permute.xlu0 %792  ;;  %v788_v55 = vadd.f32 %v786_v22, %v778_v38  ;;  %v789_v24 = vadd.f32 %v787_v45, %v779_v51 }
 0x4c6   :  { %v796_v19 = vsel %vm303_vm5, %v793_v14, %v795_v5  ;;  %v797_v47 = vsel %vm303_vm5, %v795_v5, %v793_v14 }
 0x4c7   :  { %v790_v32 = vadd.f32 %v788_v55, %v2744_v35  ;;  %v2750_v35 = vld [vmem:[#allocation26_spill] sm:$0xff] }
 0x4c9   :  { %v805_v11 = vpop.permute.xlu1 %804  ;;  %v803_v63 = vpop.permute.xlu0 %802 }
 0x4ca   :  { %v806_v12 = vsel %vm322_vm6, %v803_v63, %v805_v11  ;;  %v807_v33 = vsel %vm322_vm6, %v805_v11, %v803_v63  ;;  %v2746_v11 = vld [vmem:[#allocation23_spill] sm:$0xff]  ;;  %v2747_v63 = vmov 0  }
 0x4cb   :  { %v1637_v31 = vpop.eup %1636  ;;  %v808_v21 = vmul.f32 %v806_v12, %v1979_v42  ;;  %v809_v5 = vmul.f32 %v807_v33, %v1982_v43 }
 0x4cc   :  { %v1639_v53 = vpop.eup %1638  ;;  %v1287_v3 = vadd.f32 1.0, %v1637_v31  ;;  %v791_v31 = vadd.f32 %v789_v24, %v2745_v18 }
 0x4cd   :  { %v1288_v2 = vadd.f32 1.0, %v1639_v53  ;;  %v815_v49 = vpop.permute.xlu1 %814  ;;  %v813_v50 = vpop.permute.xlu0 %812  ;;  %v798_v53 = vmul.f32 %v796_v19, %v1967_v36  ;;  %v2748_v19 = vld [vmem:[#allocation24_spill] sm:$0xff] }
 0x4ce   :  { %1640 = vrcp.f32 %v1287_v3  ;;  %v799_v3 = vmul.f32 %v797_v47, %v1970_v37  ;;  %v817_v4 = vsel %vm341_vm7, %v815_v49, %v813_v50  ;;  %v2749_v47 = vld [vmem:[#allocation25_spill] sm:$0xff] }
 0x4cf   :  { %1642 = vrcp.f32 %v1288_v2  ;;  %v816_v2 = vsel %vm341_vm7, %v813_v50, %v815_v49  ;;  %v800_v15 = vadd.f32 %v798_v53, %v790_v32  ;;  %v819_v17 = vmul.f32 %v817_v4, %v1998_v27 }
 0x4d0   :  { %v801_v30 = vadd.f32 %v799_v3, %v791_v31  ;;  %v2752_v31 = vld [vmem:[#allocation13_spill] sm:$0xff]  ;;  %v2753_v3 = vld [vmem:[#allocation16_spill] sm:$0xff] }
 0x4d1   :  { %v810_v48 = vadd.f32 %v808_v21, %v800_v15  ;;  %v823_v56 = vpop.permute.xlu1 %822  ;;  %v1663_v15 = vld [vmem:[#allocation2 + $0x10] sm:$0xff] }
 0x4d2   :  { %v811_v7 = vadd.f32 %v809_v5, %v801_v30 }
 0x4d4   :  { %v821_v22 = vadd.f32 %v819_v17, %v811_v7 }
 0x4d8   :  { %v1641_v54 = vpop.eup %1640 }
 0x4d9   :  { %v1643_v39 = vpop.eup %1642  ;;  %v1296_v29 = vrot.slane %v1641_v54, %v2743_v44 }
 0x4da   :  { %v1300_v28 = vrot.slane %v1643_v39, %v2743_v44 }
 0x4db   :  { %v1301_v20 = vadd.f32 %v1296_v29, %v2340_v34 }
 0x4dc   :  { %v1302_v59 = vadd.f32 %v1300_v28, %v2343_v58  ;;  %v818_v58 = vmul.f32 %v816_v2, %v1995_v26  ;;  %v2754_v2 = vld [vmem:[#allocation27_spill] sm:$0xff] }
 0x4dd   :  { %v1303_v13 = vpack.c.bf16 %v1301_v20, %v1301_v20  ;;  %v2751_v20 = vld [vmem:[#allocation11_spill] sm:$0xff] }
 0x4de   :  { %v2550_v34 = vpop.permute.xlu0 %834  ;;  %v1304_v14 = vpack.c.bf16 %v1302_v59, %v1302_v59  ;;  %v820_v41 = vadd.f32 %v818_v58, %v810_v48  ;;  %v1664_v58 = vld [vmem:[#allocation2 + $0x20] sm:$0xff]  ;;  %v1665_v48 = vld [vmem:[#allocation2 + $0x30] sm:$0xff] }
 0x4df   :  { %v1306_v23 = vsel %vm664_vm9, %v1303_v13, 0 }
 0x4e0   :  { %1596 = vmatprep.subr.msk.bf16.mxu0 %vm664_vm9, %v1304_v14  ;;  %v1662_v14 = vld [vmem:[#allocation2] sm:$0xff] }
 0x4e1   :  { %1312 = vmatpush1.bf16.msra.mxu0 %v1306_v23 }
 0x4e2   :  { %v825_v40 = vpop.permute.xlu0 %824 }
 0x4e3   :  { %v826_v0 = vsel %vm360_vm8, %v823_v56, %v825_v40  ;;  %v827_v1 = vsel %vm360_vm8, %v825_v40, %v823_v56  ;;  %v1666_v56 = vld [vmem:[#allocation2 + $0x8] sm:$0xff] }
 0x4e4   :  { %v828_v52 = vmul.f32 %v826_v0, %v2008_v9  ;;  %v829_v45 = vmul.f32 %v827_v1, %v2011_v10  ;;  %1597 = vmatmul.mubr.msk.bf16.vlgmr.msra.gmra.mrb[20].mxu0 %vm648_vm10, %v2746_v11  ;;  %v1667_v0 = vld [vmem:[#allocation2 + $0x18] sm:$0xff] }
 0x4e5   :  { %1353 = vmatprep.mubr.bf16.mxu0 %v2747_v63 }
 0x4e6   :  { %v830_v38 = vadd.f32 %v828_v52, %v820_v41  ;;  %v831_v51 = vadd.f32 %v829_v45, %v821_v22  ;;  %v1668_v41 = vld [vmem:[#allocation2 + $0x28] sm:$0xff]  ;;  %v1669_v52 = vld [vmem:[#allocation2 + $0x38] sm:$0xff] }
 0x4e8   :  { %v837_v55 = vadd.f32 %v2550_v34, %v830_v38  ;;  %v838_v54 = vadd.f32 %v2550_v34, %v831_v51 }
 0x4ea   :  { %v1587_v24 = vmul.f32 -1.442695, %v837_v55  ;;  %v1588_v39 = vmul.f32 -1.442695, %v838_v54 }
 0x4ec   :  { %1644 = vpow2.f32 %v1587_v24  ;;  %1598 = vmatmul.mubr.msk.bf16.gmra.mrb[24].mxu0 %vm648_vm10, %v2748_v19 }
 0x4ed   :  { %1646 = vpow2.f32 %v1588_v39  ;;  %1363 = vmatprep.mubr.bf16.mxu0 %v2747_v63 }
 0x4f4   :  { %1599 = vmatmul.mubr.msk.bf16.gmra.mrb[28].mxu0 %vm648_vm10, %v2749_v47 }
 0x4f5   :  { %1373 = vmatprep.mubr.bf16.mxu0 %v2747_v63 }
 0x4f6   :  { %v1645_v29 = vpop.eup %1644 }
 0x4f7   :  { %v1647_v49 = vpop.eup %1646  ;;  %v845_v50 = vadd.f32 1.0, %v1645_v29 }
 0x4f8   :  { %v846_v28 = vadd.f32 1.0, %v1647_v49 }
 0x4f9   :  { %1648 = vrcp.f32 %v845_v50 }
 0x4fa   :  { %1650 = vrcp.f32 %v846_v28 }
 0x4fc   :  { %1600 = vmatmul.mubr.msk.bf16.gmra.mrb[32].mxu0 %vm648_vm10, %v2750_v35 }
 0x4fd   :  { %1383 = vmatprep.mubr.bf16.mxu0 %v2747_v63 }
 0x503   :  { %v1649_v32 = vpop.eup %1648 }
 0x504   :  { %v1651_v12 = vpop.eup %1650  ;;  %v854_v33 = vrot.slane %v1649_v32, %v2743_v44  ;;  %v866_v18 = vrot.slane %v1649_v32, %v2751_v20  ;;  %v878_v53 = vrot.slane %v1649_v32, %v2752_v31  ;;  %v890_v59 = vrot.slane %v1649_v32, %v2753_v3  ;;  %1601 = vmatmul.mubr.msk.bf16.gmra.mrb[36].mxu0 %vm648_vm10, %v2754_v2 }
 0x505   :  { %v858_v4 = vrot.slane %v1651_v12, %v2743_v44  ;;  %v870_v13 = vrot.slane %v1651_v12, %v2751_v20  ;;  %v882_v21 = vrot.slane %v1651_v12, %v2752_v31  ;;  %v894_v5 = vrot.slane %v1651_v12, %v2753_v3 }
 0x506   :  { %v859_v23 = vmul.f32 %v1662_v14, %v854_v33  ;;  %v871_v30 = vmul.f32 %v1663_v15, %v866_v18  ;;  %v883_v17 = vmul.f32 %v1664_v58, %v878_v53  ;;  %v895_v7 = vmul.f32 %v1665_v48, %v890_v59 }
 0x507   :  { %v860_v40 = vmul.f32 %v1666_v56, %v858_v4  ;;  %v872_v1 = vmul.f32 %v1667_v0, %v870_v13  ;;  %v884_v22 = vmul.f32 %v1668_v41, %v882_v21  ;;  %v896_v45 = vmul.f32 %v1669_v52, %v894_v5 }
 0x508   :  { %861 = vst [vmem:[#allocation7] sm:$0xff] %v859_v23  ;;  %873 = vst [vmem:[#allocation7 + $0x10] sm:$0xff] %v871_v30 }
 0x509   :  { %885 = vst [vmem:[#allocation7 + $0x20] sm:$0xff] %v883_v17  ;;  %897 = vst [vmem:[#allocation7 + $0x30] sm:$0xff] %v895_v7 }
 0x50a   :  { %862 = vst [vmem:[#allocation7 + $0x8] sm:$0xff] %v860_v40  ;;  %874 = vst [vmem:[#allocation7 + $0x18] sm:$0xff] %v872_v1 }
 0x50b   :  { %886 = vst [vmem:[#allocation7 + $0x28] sm:$0xff] %v884_v22  ;;  %898 = vst [vmem:[#allocation7 + $0x38] sm:$0xff] %v896_v45 }
 0x5b7   :  { %v1345_v11 = vpop.f32.mrb[20].mxu0 }
 0x5b8   :  { %v1347_v63 = vpop.f32.mrb[21].mxu0  ;;  %1392 = vrot.lane.b32.xlu0 %v1345_v11, %s1745_s28 }
 0x5b9   :  { %1394 = vrot.lane.b32.xlu1 %v1347_v63, %s1745_s28  ;;  %v1349_v38 = vpop.f32.mrb[22].mxu0  ;;  %s1540_s28 = sshll.u32 %s1752_s4, 4  ;;  %s1541_s28 = int_to_ptr.vmem [resolvable:$true] %s1540_s28 }
 0x5ba   :  { %v1351_v51 = vpop.f32.mrb[23].mxu0  ;;  %p1717_p0 = scmp.lt.s32.totalorder %s1541_s28, %s1541_s28 }
 0x5bc   :  { %1400 = vrot.lane.b32.xlu0 %v1349_v38, %s1742_s14 }
 0x5bd   :  { %1402 = vrot.lane.b32.xlu1 %v1351_v51, %s1742_s14 }
 0x5bf   :  { %v1355_v55 = vpop.f32.mrb[24].mxu0 }
 0x5c0   :  { %v1357_v54 = vpop.f32.mrb[25].mxu0  ;;  %1410 = vrot.lane.b32.xlu0 %v1355_v55, %s1746_s1 }
 0x5c1   :  { %1412 = vrot.lane.b32.xlu1 %v1357_v54, %s1746_s1  ;;  %v1359_v24 = vpop.f32.mrb[26].mxu0  ;;  %s1712_s1 = scalar_lea.vmem %s1541_s28, 2048 }
 0x5c2   :  { %v1361_v39 = vpop.f32.mrb[27].mxu0  ;;  %p1713_p13 = scmp.ne.s32.totalorder %s1541_s28, %s1712_s1  ;;  %p1718_p1 = scmp.lt.s32.totalorder %s1712_s1, %s1712_s1 }
 0x5c4   :  { %1420 = vrot.lane.b32.xlu0 %v1359_v24, %s1747_s29  ;;  %p1719_p2 = por %p1718_p1, %p1717_p0 }
 0x5c5   :  { %1422 = vrot.lane.b32.xlu1 %v1361_v39, %s1747_s29 }
 0x5c6   :  { %p1720_p3 = pnand %p1719_p2, %p1713_p13 }
 0x5c7   :  { %v1365_v19 = vpop.f32.mrb[28].mxu0 }
 0x5c8   :  { %v1367_v47 = vpop.f32.mrb[29].mxu0 }
 0x5c9   :  { %v1369_v29 = vpop.f32.mrb[30].mxu0 }
 0x5ca   :  { %v1371_v49 = vpop.f32.mrb[31].mxu0  ;;  %1432 = vrot.lane.b32.xlu0 %v1369_v29, %s1748_s30 }
 0x5cb   :  { %1434 = vrot.lane.b32.xlu1 %v1371_v49, %s1748_s30 }
 0x5cf   :  { %v1375_v50 = vpop.f32.mrb[32].mxu0 }
 0x5d0   :  { %v1377_v28 = vpop.f32.mrb[33].mxu0  ;;  %1442 = vrot.lane.b32.xlu0 %v1375_v50, %s1749_s8 }
 0x5d1   :  { %1444 = vrot.lane.b32.xlu1 %v1377_v28, %s1749_s8  ;;  %v1379_v35 = vpop.f32.mrb[34].mxu0 }
 0x5d2   :  { %v1381_v32 = vpop.f32.mrb[35].mxu0 }
 0x5d4   :  { %1454 = vrot.lane.b32.xlu0 %v1381_v32, %s1750_s9 }
 0x5d5   :  { %1452 = vrot.lane.b32.xlu1 %v1379_v35, %s1750_s9 }
 0x5d7   :  { %v1385_v12 = vpop.f32.mrb[36].mxu0 }
 0x5d8   :  { %v1387_v33 = vpop.f32.mrb[37].mxu0 }
 0x5d9   :  { %1462 = vrot.lane.b32.xlu1 %v1385_v12, %s1751_s12  ;;  %1464 = vrot.lane.b32.xlu0 %v1387_v33, %s1751_s12  ;;  %v1389_v18 = vpop.f32.mrb[38].mxu0 }
 0x5da   :  { %v1390_v53 = vpop.f32.mrb[39].mxu0 }
 0x62a   :  { %v1393_v59 = vpop.permute.xlu0 %1392 }
 0x62b   :  { %v1395_v2 = vpop.permute.xlu1 %1394 }
 0x62c   :  { %v1396_v58 = vsel %vm227_vm2, %v1393_v59, %v1395_v2  ;;  %v1397_v17 = vsel %vm227_vm2, %v1395_v2, %v1393_v59 }
 0x62d   :  { %v1398_v41 = vmul.f32 %v1397_v17, %v1916_v57  ;;  %v1399_v22 = vmul.f32 %v1396_v58, %v1924_v60 }
 0x62e   :  { %v1401_v4 = vpop.permute.xlu0 %1400 }
 0x62f   :  { %v1403_v13 = vpop.permute.xlu1 %1402 }
 0x630   :  { %v1404_v14 = vsel %vm244_vm1, %v1401_v4, %v1403_v13  ;;  %v1405_v23 = vsel %vm244_vm1, %v1403_v13, %v1401_v4 }
 0x631   :  { %v1406_v56 = vmul.f32 %v1405_v23, %v2741_v25  ;;  %v1407_v40 = vmul.f32 %v1404_v14, %v2742_v16 }
 0x632   :  { %v1411_v21 = vpop.permute.xlu0 %1410 }
 0x633   :  { %v1413_v5 = vpop.permute.xlu1 %1412  ;;  %v1408_v63 = vadd.f32 %v1406_v56, %v1398_v41  ;;  %v1409_v38 = vadd.f32 %v1407_v40, %v1399_v22 }
 0x634   :  { %v1414_v48 = vsel %vm263_vm3, %v1411_v21, %v1413_v5  ;;  %v1415_v7 = vsel %vm263_vm3, %v1413_v5, %v1411_v21 }
 0x635   :  { %v1416_v52 = vmul.f32 %v1415_v7, %v1928_v61  ;;  %v1417_v45 = vmul.f32 %v1414_v48, %v1932_v62 }
 0x636   :  { %v1421_v15 = vpop.permute.xlu0 %1420 }
 0x637   :  { %v1423_v30 = vpop.permute.xlu1 %1422  ;;  %v1418_v55 = vadd.f32 %v1416_v52, %v1408_v63  ;;  %v1419_v54 = vadd.f32 %v1417_v45, %v1409_v38  ;;  %v1671_v38 = vld [vmem:[#allocation2 + $0x50] sm:$0xff] }
 0x638   :  { %v1424_v0 = vsel %vm282_vm4, %v1421_v15, %v1423_v30  ;;  %v1425_v1 = vsel %vm282_vm4, %v1423_v30, %v1421_v15 }
 0x639   :  { %v1426_v25 = vmul.f32 %v1425_v1, %v1947_v6  ;;  %v1427_v16 = vmul.f32 %v1424_v0, %v1951_v8 }
 0x63b   :  { %v1428_v61 = vadd.f32 %v1426_v25, %v1418_v55  ;;  %v1429_v39 = vadd.f32 %v1427_v16, %v1419_v54  ;;  %v1672_v16 = vld [vmem:[#allocation2 + $0x60] sm:$0xff]  ;;  %v1673_v55 = vld [vmem:[#allocation2 + $0x70] sm:$0xff] }
 0x63c   :  { %v1433_v11 = vpop.permute.xlu0 %1432 }
 0x63d   :  { %v1435_v51 = vpop.permute.xlu1 %1434  ;;  %v1430_v28 = vadd.f32 %v1428_v61, %v1365_v19  ;;  %v1431_v35 = vadd.f32 %v1429_v39, %v1367_v47  ;;  %v1676_v39 = vld [vmem:[#allocation2 + $0x68] sm:$0xff] }
 0x63e   :  { %v1436_v24 = vsel %vm303_vm5, %v1433_v11, %v1435_v51  ;;  %v1437_v57 = vsel %vm303_vm5, %v1435_v51, %v1433_v11  ;;  %v1670_v11 = vld [vmem:[#allocation2 + $0x40] sm:$0xff] }
 0x63f   :  { %v1438_v8 = vmul.f32 %v1436_v24, %v1967_v36  ;;  %v1439_v49 = vmul.f32 %v1437_v57, %v1970_v37  ;;  %v1674_v24 = vld [vmem:[#allocation2 + $0x48] sm:$0xff] }
 0x641   :  { %v1440_v59 = vadd.f32 %v1438_v8, %v1430_v28  ;;  %v1441_v2 = vadd.f32 %v1439_v49, %v1431_v35 }
 0x642   :  { %v1443_v60 = vpop.permute.xlu0 %1442 }
 0x643   :  { %v1445_v62 = vpop.permute.xlu1 %1444 }
 0x644   :  { %v1446_v29 = vsel %vm322_vm6, %v1443_v60, %v1445_v62  ;;  %v1447_v6 = vsel %vm322_vm6, %v1445_v62, %v1443_v60  ;;  %v1675_v60 = vld [vmem:[#allocation2 + $0x58] sm:$0xff] }
 0x645   :  { %v1448_v32 = vmul.f32 %v1446_v29, %v1979_v42  ;;  %v1449_v12 = vmul.f32 %v1447_v6, %v1982_v43  ;;  %v1677_v62 = vld [vmem:[#allocation2 + $0x78] sm:$0xff] }
 0x646   :  { %v1455_v50 = vpop.permute.xlu0 %1454 }
 0x647   :  { %v1453_v33 = vpop.permute.xlu1 %1452  ;;  %v1450_v4 = vadd.f32 %v1448_v32, %v1440_v59  ;;  %v1451_v19 = vadd.f32 %v1449_v12, %v1441_v2 }
 0x648   :  { %v1456_v18 = vsel %vm341_vm7, %v1453_v33, %v1455_v50  ;;  %v1457_v53 = vsel %vm341_vm7, %v1455_v50, %v1453_v33 }
 0x649   :  { %v1458_v36 = vmul.f32 %v1456_v18, %v1995_v26  ;;  %v1459_v37 = vmul.f32 %v1457_v53, %v1998_v27 }
 0x64b   :  { %v1463_v47 = vpop.permute.xlu1 %1462  ;;  %v1465_v13 = vpop.permute.xlu0 %1464  ;;  %v1460_v21 = vadd.f32 %v1458_v36, %v1450_v4  ;;  %v1461_v5 = vadd.f32 %v1459_v37, %v1451_v19 }
 0x64c   :  { %v1466_v42 = vsel %vm360_vm8, %v1463_v47, %v1465_v13  ;;  %v1467_v43 = vsel %vm360_vm8, %v1465_v13, %v1463_v47 }
 0x64d   :  { %v1468_v14 = vmul.f32 %v1466_v42, %v2008_v9  ;;  %v1469_v23 = vmul.f32 %v1467_v43, %v2011_v10 }
 0x64f   :  { %v1470_v15 = vadd.f32 %v1468_v14, %v1460_v21  ;;  %v1471_v26 = vadd.f32 %v1469_v23, %v1461_v5 }
 0x651   :  { %v1472_v27 = vadd.f32 %v1470_v15, %v2550_v34  ;;  %v1473_v30 = vadd.f32 %v1471_v26, %v2550_v34 }
 0x653   :  { %v1602_v58 = vmul.f32 -1.442695, %v1472_v27  ;;  %v1603_v17 = vmul.f32 -1.442695, %v1473_v30 }
 0x655   :  { %1652 = vpow2.f32 %v1602_v58 }
 0x656   :  { %1654 = vpow2.f32 %v1603_v17 }
 0x65f   :  { %v1653_v48 = vpop.eup %1652 }
 0x660   :  { %v1655_v7 = vpop.eup %1654  ;;  %v1480_v46 = vadd.f32 1.0, %v1653_v48 }
 0x661   :  { %v1481_v56 = vadd.f32 1.0, %v1655_v7 }
 0x662   :  { %1656 = vrcp.f32 %v1480_v46 }
 0x663   :  { %1658 = vrcp.f32 %v1481_v56 }
 0x66c   :  { %v1657_v40 = vpop.eup %1656 }
 0x66d   :  { %v1659_v9 = vpop.eup %1658  ;;  %v1489_v10 = vrot.slane %v1657_v40, %v2743_v44  ;;  %v1502_v0 = vrot.slane %v1657_v40, %v2751_v20  ;;  %v1514_v1 = vrot.slane %v1657_v40, %v2752_v31  ;;  %v1526_v34 = vrot.slane %v1657_v40, %v2753_v3 }
 0x66e   :  { %v1493_v41 = vrot.slane %v1659_v9, %v2743_v44  ;;  %v1506_v22 = vrot.slane %v1659_v9, %v2751_v20  ;;  %v1518_v52 = vrot.slane %v1659_v9, %v2752_v31  ;;  %v1530_v45 = vrot.slane %v1659_v9, %v2753_v3 }
 0x66f   :  { %v1494_v63 = vmul.f32 %v1670_v11, %v1489_v10  ;;  %v1507_v25 = vmul.f32 %v1671_v38, %v1502_v0  ;;  %v1519_v51 = vmul.f32 %v1672_v16, %v1514_v1  ;;  %v1531_v54 = vmul.f32 %v1673_v55, %v1526_v34 }
 0x670   :  { %v1495_v57 = vmul.f32 %v1674_v24, %v1493_v41  ;;  %v1508_v61 = vmul.f32 %v1675_v60, %v1506_v22  ;;  %v1520_v44 = vmul.f32 %v1676_v39, %v1518_v52  ;;  %v1532_v20 = vmul.f32 %v1677_v62, %v1530_v45 }
 0x671   :  { %1497 = vst [vmem:[#allocation7 + $0x40] sm:$0xff] %v1494_v63  ;;  %1509 = vst [vmem:[#allocation7 + $0x50] sm:$0xff] %v1507_v25 }
 0x672   :  { %1521 = vst [vmem:[#allocation7 + $0x60] sm:$0xff] %v1519_v51  ;;  %1533 = vst [vmem:[#allocation7 + $0x70] sm:$0xff] %v1531_v54 }
 0x673   :  { %1498 = vst [vmem:[#allocation7 + $0x48] sm:$0xff] %v1495_v57  ;;  %1510 = vst [vmem:[#allocation7 + $0x58] sm:$0xff] %v1508_v61 }
 0x674   :  { %1522 = vst [vmem:[#allocation7 + $0x68] sm:$0xff] %v1520_v44  ;;  %1534 = vst [vmem:[#allocation7 + $0x78] sm:$0xff] %v1532_v20 }
 0x675   :  { %1723 = shalt.err (!%p1720_p3)
}
 0x676   :  { %s1724_s8 = scalar_lea.hbm %s2682_s7, 2048 }
 0x677   :  { %p1725_p4 = scmp.ne.s32.totalorder %s2682_s7, %s1724_s8  ;;  %p1728_p5 = scmp.lt.u32.totalorder %s1724_s8, %s2682_s7 }
 0x679   :  { %p1730_p6 = pnand %p1728_p5, %p1725_p4 }
 0x67b   :  { %1733 = shalt.err (!%p1730_p6)
}
 0x67c   :  { %1546 = dma.vmem_to_hbm [thread:$0]  %s1541_s28, 2048, %s2682_s7, [#allocation4], %s1741_s3, %s1741_s3, %s1742_s14  }
 0x67d   :  { %1738 = dma.done.wait [#allocation4], 2048  }
 0x67e   :  { %1739 = vsyncadd [#allocation4], 4294965248 }
 0x67f   :  { %1550 = vsyncpa [#allocation3], 1 }
 0x680   :  { %1551 = vsyncpa [#allocation4], 1 }
 0x681   :  { %1552 = vsyncpa [#allocation5], 1 }

</bundles_post_ra>
